<compile_context>
chip_gen: v6e
topology: v6e:2x2x1
jax: 0.10.0
libtpu: 0.0.40
codegen_flags: <defaults>
</compile_context>

<pallas_src>
import jax
import jax.numpy as jnp
import numpy as np
from jax.experimental import pallas as pl
from jax.experimental.pallas import tpu as pltpu

EPS = 1e-5


def cnn_block(x_nchw, params):
    """Fused CNNBlock forward. NCHW in, NCHW out (PyTorch convention)."""
    (w1_pt, w2_pt, w3_pt, wm_pt,
     g1, b1, g2, b2, g3, b3, gm, bm) = params
    N, Cin, H, W = x_nchw.shape
    Cout = w1_pt.shape[0]
    R = N * H                    # slab rows
    WC = W * Cout                # slab lanes (128 at the test shapes)
    inv_m = 1.0 / float(N * H * W)
    f32 = jnp.float32

    # ---- lane-dense input slab: (N*H, W*Cin), built in the wrapper so the
    #      kernel never reshapes.
    x_slab = jnp.transpose(x_nchw, (0, 2, 3, 1)).astype(f32).reshape(R, W * Cin)

    eye_w = jnp.eye(W, dtype=f32)

    # ---- fused pointwise weight: conv1 | match_channels, block-diagonal per
    #      pixel column.  (W*Cin, 2*W*Cout)
    w1m = jnp.concatenate(
        [jnp.kron(eye_w, jnp.transpose(w1_pt[:, :, 0, 0])),
         jnp.kron(eye_w, jnp.transpose(wm_pt[:, :, 0, 0]))], axis=1)

    # ---- banded 3x3 operators.  B[kh][w_in*C+ci, w_out*C+co] = w[co,ci,kh,kw]
    #      where w_in = w_out + (kw-1); the 'same' boundary in w and the kw
    #      shift are encoded in the band structure (eye(W, k=1-kw)).
    def band(w_oihw, depthwise):
        blocks = []
        for kh in range(3):
            blk = jnp.zeros((WC, WC), f32)
            for kw in range(3):
                shift = jnp.eye(W, k=1 - kw, dtype=f32)
                if depthwise:
                    mix = jnp.diag(w_oihw[:, 0, kh, kw])          # (C, C)
                else:
                    mix = jnp.transpose(w_oihw[:, :, kh, kw])     # (Ci, Co)
                blk = blk + jnp.kron(shift, mix)
            blocks.append(blk)
        return jnp.concatenate(blocks, axis=0)                    # (3*WC, WC)

    w2b = band(w2_pt, depthwise=True)     # depthwise 3x3
    w3b = band(w3_pt, depthwise=False)    # dense 3x3

    # ---- merged row-shift operator: rows [0:R) give y[h-1] (kh=0), rows
    #      [R:2R) give y[h+1] (kh=2); zero at image h-boundaries.  (2R, R)
    srow = jnp.concatenate(
        [jnp.kron(jnp.eye(N, dtype=f32), jnp.eye(H, k=-1, dtype=f32)),
         jnp.kron(jnp.eye(N, dtype=f32), jnp.eye(H, k=1, dtype=f32))], axis=0)

    # ---- per-channel sum-and-broadcast over the W positions packed in lanes
    psum = jnp.kron(jnp.ones((W, W), f32), jnp.eye(Cout, dtype=f32))  # (WC, WC)

    # ---- BN affine params packed into one (8, W*Cout) operand:
    #      rows = [g1, b1, g2, b2, g3, b3, gm, bm], each tiled over W.
    tile = lambda v: jnp.tile(v.astype(f32), W).reshape(1, WC)
    bn_params = jnp.concatenate(
        [tile(v) for v in (g1, b1, g2, b2, g3, b3, gm, bm)], axis=0)

    def kernel(x_ref, w1m_ref, s_ref, p_ref, w2b_ref, w3b_ref, bnp_ref, o_ref):
        # Single-pass BatchNorm folded into per-lane scale/shift.  idx is a
        # static Python int selecting (gamma, beta) rows of bnp_ref.
        def bn(t, idx):
            g = bnp_ref[2 * idx:2 * idx + 1, :]
            b = bnp_ref[2 * idx + 1:2 * idx + 2, :]
            sums = jnp.concatenate(
                [jnp.sum(t, axis=0, keepdims=True),
                 jnp.sum(t * t, axis=0, keepdims=True)], axis=0)      # (2, WC)
            stats = jnp.dot(sums, p_ref[...],
                            preferred_element_type=jnp.float32) * inv_m
            mean, ex2 = stats[0:1, :], stats[1:2, :]
            scale = g * jax.lax.rsqrt(ex2 - mean * mean + EPS)
            return t * scale + (b - mean * scale)

        # 3x3 conv = one merged row-shift matmul + one banded lane matmul.
        def conv3x3(t, band_ref):
            shifted = jnp.dot(s_ref[...], t,
                              preferred_element_type=jnp.float32)     # (2R, WC)
            taps = jnp.concatenate([shifted[:R, :], t, shifted[R:, :]],
                                   axis=1)                            # (R, 3*WC)
            return jnp.dot(taps, band_ref[...],
                           preferred_element_type=jnp.float32)

        x2d = x_ref[...]                                              # (R, W*Cin)

        # conv1 and match_channels share one MXU pass.
        both = jnp.dot(x2d, w1m_ref[...], preferred_element_type=jnp.float32)
        y = jnp.maximum(bn(both[:, :WC], 0), 0.0)                     # conv1+BN1+relu
        y = jnp.maximum(bn(conv3x3(y, w2b_ref), 1), 0.0)              # dw3x3+BN2+relu
        y = bn(conv3x3(y, w3b_ref), 2)                                # conv3+BN3
        idn = bn(both[:, WC:], 3)                                     # match+BNm
        o_ref[...] = jnp.maximum(y + idn, 0.0)

    vmem = pl.BlockSpec(memory_space=pltpu.MemorySpace.VMEM)
    out_slab = pl.pallas_call(
        kernel,
        out_shape=jax.ShapeDtypeStruct((R, WC), jnp.float32),
        in_specs=[vmem] * 7,
        out_specs=vmem,
    )(x_slab, w1m, srow, psum, w2b, w3b, bn_params)

    return jnp.transpose(out_slab.reshape(N, H, W, Cout), (0, 3, 1, 2))


def init_params(key, cin, cout):
    """Deterministic synthetic parameters in PyTorch weight layouts."""
    ks = jax.random.split(key, 12)
    w1 = 0.3 * jax.random.normal(ks[0], (cout, cin, 1, 1), jnp.float32)
    w2 = 0.3 * jax.random.normal(ks[1], (cout, 1, 3, 3), jnp.float32)
    w3 = 0.3 * jax.random.normal(ks[2], (cout, cout, 3, 3), jnp.float32)
    wm = 0.3 * jax.random.normal(ks[3], (cout, cin, 1, 1), jnp.float32)

    def bn(kg, kb):
        g = 1.0 + 0.1 * jax.random.normal(kg, (cout,), jnp.float32)
        b = 0.1 * jax.random.normal(kb, (cout,), jnp.float32)
        return g, b

    g1, b1 = bn(ks[4], ks[5])
    g2, b2 = bn(ks[6], ks[7])
    g3, b3 = bn(ks[8], ks[9])
    gm, bm = bn(ks[10], ks[11])
    return (w1, w2, w3, wm, g1, b1, g2, b2, g3, b3, gm, bm)


def reference(x_nchw, params):
    """Pure-JAX/XLA reference mirroring the PyTorch forward."""
    (w1_pt, w2_pt, w3_pt, wm_pt,
     g1, b1, g2, b2, g3, b3, gm, bm) = params
    x = jnp.transpose(x_nchw, (0, 2, 3, 1)).astype(jnp.float32)   # NHWC
    Cout = w1_pt.shape[0]

    def conv(t, w_oihw, groups=1):
        return jax.lax.conv_general_dilated(
            t, jnp.transpose(w_oihw, (2, 3, 1, 0)),               # OIHW -> HWIO
            window_strides=(1, 1), padding='SAME',
            dimension_numbers=('NHWC', 'HWIO', 'NHWC'),
            feature_group_count=groups,
            precision=jax.lax.Precision.HIGHEST)

    def bn(t, g, b):
        mean = jnp.mean(t, axis=(0, 1, 2), keepdims=True)
        var = jnp.mean((t - mean) ** 2, axis=(0, 1, 2), keepdims=True)
        return (t - mean) / jnp.sqrt(var + EPS) * g + b

    y = jax.nn.relu(bn(conv(x, w1_pt), g1, b1))
    y = jax.nn.relu(bn(conv(y, w2_pt, groups=Cout), g2, b2))
    y = bn(conv(y, w3_pt), g3, b3)
    idn = bn(conv(x, wm_pt), gm, bm)
    return jnp.transpose(jax.nn.relu(y + idn), (0, 3, 1, 2))


if __name__ == "__main__":
    key = jax.random.PRNGKey(0)
    kx, kp = jax.random.split(key)

    N, Cin, Cout, H, W = 2, 4, 8, 16, 16
    x = jax.random.normal(kx, (N, Cin, H, W), jnp.float32)        # NCHW like PyTorch
    params = init_params(kp, Cin, Cout)

    out = jax.block_until_ready(cnn_block(x, params))
    ref = jax.block_until_ready(reference(x, params))
    assert out.shape == (N, Cout, H, W), out.shape
    np.testing.assert_allclose(np.asarray(out), np.asarray(ref),
                               rtol=1e-3, atol=1e-3)
    print("KERNEL_OK")
</pallas_src>

<mosaic_0001>
module attributes {stable_mosaic.version = 11 : i64} {
  func.func @kernel(%arg0: memref<32x64xf32, #tpu.memory_space<vmem>>, %arg1: memref<64x256xf32, #tpu.memory_space<vmem>>, %arg2: memref<64x32xf32, #tpu.memory_space<vmem>>, %arg3: memref<128x128xf32, #tpu.memory_space<vmem>>, %arg4: memref<384x128xf32, #tpu.memory_space<vmem>>, %arg5: memref<384x128xf32, #tpu.memory_space<vmem>>, %arg6: memref<8x128xf32, #tpu.memory_space<vmem>>, %arg7: memref<32x128xf32, #tpu.memory_space<vmem>>) attributes {dimension_semantics = [], scalar_prefetch = 0 : i64, scratch_operands = 0 : i64, tpu.core_type = #tpu.core_type<tc>} {
    %c0 = arith.constant 0 : index
    %c0_0 = arith.constant 0 : index
    %0 = vector.load %arg0[%c0, %c0_0] : memref<32x64xf32, #tpu.memory_space<vmem>>, vector<32x64xf32>
    %c0_1 = arith.constant 0 : index
    %c0_2 = arith.constant 0 : index
    %1 = vector.load %arg1[%c0_1, %c0_2] : memref<64x256xf32, #tpu.memory_space<vmem>>, vector<64x256xf32>
    %cst = arith.constant dense<0.000000e+00> : vector<32x256xf32>
    %2 = tpu.matmul %0, %1, %cst {dimension_numbers = #tpu.dot_dimension_numbers<[1], [0], [0], [1], [0, 0, 1, 1], [], []>} : vector<32x64xf32>, vector<64x256xf32>, vector<32x256xf32> -> vector<32x256xf32>
    %3 = vector.extract_strided_slice %2 {offsets = [0, 0], sizes = [32, 128], strides = [1, 1]} : vector<32x256xf32> to vector<32x128xf32>
    %c0_3 = arith.constant 0 : index
    %c0_4 = arith.constant 0 : index
    %4 = vector.load %arg6[%c0_3, %c0_4] : memref<8x128xf32, #tpu.memory_space<vmem>>, vector<1x128xf32>
    %c1 = arith.constant 1 : index
    %c0_5 = arith.constant 0 : index
    %5 = vector.load %arg6[%c1, %c0_5] : memref<8x128xf32, #tpu.memory_space<vmem>>, vector<1x128xf32>
    %cst_6 = arith.constant dense<0.000000e+00> : vector<128xf32>
    %6 = vector.multi_reduction <add>, %3, %cst_6 [0] : vector<32x128xf32> to vector<128xf32>
    %7 = vector.shape_cast %6 : vector<128xf32> to vector<1x128xf32>
    %8 = arith.mulf %3, %3 : vector<32x128xf32>
    %cst_7 = arith.constant dense<0.000000e+00> : vector<128xf32>
    %9 = vector.multi_reduction <add>, %8, %cst_7 [0] : vector<32x128xf32> to vector<128xf32>
    %10 = vector.shape_cast %9 : vector<128xf32> to vector<1x128xf32>
    %11 = tpu.concatenate %7, %10 in 0 : vector<1x128xf32>, vector<1x128xf32> -> vector<2x128xf32>
    %c0_8 = arith.constant 0 : index
    %c0_9 = arith.constant 0 : index
    %12 = vector.load %arg3[%c0_8, %c0_9] : memref<128x128xf32, #tpu.memory_space<vmem>>, vector<128x128xf32>
    %cst_10 = arith.constant dense<0.000000e+00> : vector<2x128xf32>
    %13 = tpu.matmul %11, %12, %cst_10 {dimension_numbers = #tpu.dot_dimension_numbers<[1], [0], [0], [1], [0, 0, 1, 1], [], []>} : vector<2x128xf32>, vector<128x128xf32>, vector<2x128xf32> -> vector<2x128xf32>
    %cst_11 = arith.constant 0.001953125 : f32
    %14 = vector.broadcast %cst_11 : f32 to vector<2x128xf32>
    %15 = arith.mulf %13, %14 : vector<2x128xf32>
    %16 = vector.extract_strided_slice %15 {offsets = [0, 0], sizes = [1, 128], strides = [1, 1]} : vector<2x128xf32> to vector<1x128xf32>
    %17 = vector.extract_strided_slice %15 {offsets = [1, 0], sizes = [1, 128], strides = [1, 1]} : vector<2x128xf32> to vector<1x128xf32>
    %18 = arith.mulf %16, %16 : vector<1x128xf32>
    %19 = arith.subf %17, %18 : vector<1x128xf32>
    %cst_12 = arith.constant 9.99999974E-6 : f32
    %20 = vector.broadcast %cst_12 : f32 to vector<1x128xf32>
    %21 = arith.addf %19, %20 : vector<1x128xf32>
    %22 = math.rsqrt %21 : vector<1x128xf32>
    %23 = arith.mulf %4, %22 : vector<1x128xf32>
    %24 = vector.broadcast %23 : vector<1x128xf32> to vector<32x128xf32>
    %25 = arith.mulf %3, %24 : vector<32x128xf32>
    %26 = arith.mulf %16, %23 : vector<1x128xf32>
    %27 = arith.subf %5, %26 : vector<1x128xf32>
    %28 = vector.broadcast %27 : vector<1x128xf32> to vector<32x128xf32>
    %29 = arith.addf %25, %28 : vector<32x128xf32>
    %cst_13 = arith.constant 0.000000e+00 : f32
    %30 = vector.broadcast %cst_13 : f32 to vector<32x128xf32>
    %31 = arith.maximumf %29, %30 : vector<32x128xf32>
    %c0_14 = arith.constant 0 : index
    %c0_15 = arith.constant 0 : index
    %32 = vector.load %arg2[%c0_14, %c0_15] : memref<64x32xf32, #tpu.memory_space<vmem>>, vector<64x32xf32>
    %cst_16 = arith.constant dense<0.000000e+00> : vector<64x128xf32>
    %33 = tpu.matmul %32, %31, %cst_16 {dimension_numbers = #tpu.dot_dimension_numbers<[1], [0], [0], [1], [0, 0, 1, 1], [], []>} : vector<64x32xf32>, vector<32x128xf32>, vector<64x128xf32> -> vector<64x128xf32>
    %34 = vector.extract_strided_slice %33 {offsets = [0, 0], sizes = [32, 128], strides = [1, 1]} : vector<64x128xf32> to vector<32x128xf32>
    %35 = vector.extract_strided_slice %33 {offsets = [32, 0], sizes = [32, 128], strides = [1, 1]} : vector<64x128xf32> to vector<32x128xf32>
    %36 = tpu.concatenate %34, %31, %35 in 1 : vector<32x128xf32>, vector<32x128xf32>, vector<32x128xf32> -> vector<32x384xf32>
    %c0_17 = arith.constant 0 : index
    %c0_18 = arith.constant 0 : index
    %37 = vector.load %arg4[%c0_17, %c0_18] : memref<384x128xf32, #tpu.memory_space<vmem>>, vector<384x128xf32>
    %cst_19 = arith.constant dense<0.000000e+00> : vector<32x128xf32>
    %38 = tpu.matmul %36, %37, %cst_19 {dimension_numbers = #tpu.dot_dimension_numbers<[1], [0], [0], [1], [0, 0, 1, 1], [], []>} : vector<32x384xf32>, vector<384x128xf32>, vector<32x128xf32> -> vector<32x128xf32>
    %c2 = arith.constant 2 : index
    %c0_20 = arith.constant 0 : index
    %39 = vector.load %arg6[%c2, %c0_20] : memref<8x128xf32, #tpu.memory_space<vmem>>, vector<1x128xf32>
    %c3 = arith.constant 3 : index
    %c0_21 = arith.constant 0 : index
    %40 = vector.load %arg6[%c3, %c0_21] : memref<8x128xf32, #tpu.memory_space<vmem>>, vector<1x128xf32>
    %cst_22 = arith.constant dense<0.000000e+00> : vector<128xf32>
    %41 = vector.multi_reduction <add>, %38, %cst_22 [0] : vector<32x128xf32> to vector<128xf32>
    %42 = vector.shape_cast %41 : vector<128xf32> to vector<1x128xf32>
    %43 = arith.mulf %38, %38 : vector<32x128xf32>
    %cst_23 = arith.constant dense<0.000000e+00> : vector<128xf32>
    %44 = vector.multi_reduction <add>, %43, %cst_23 [0] : vector<32x128xf32> to vector<128xf32>
    %45 = vector.shape_cast %44 : vector<128xf32> to vector<1x128xf32>
    %46 = tpu.concatenate %42, %45 in 0 : vector<1x128xf32>, vector<1x128xf32> -> vector<2x128xf32>
    %c0_24 = arith.constant 0 : index
    %c0_25 = arith.constant 0 : index
    %47 = vector.load %arg3[%c0_24, %c0_25] : memref<128x128xf32, #tpu.memory_space<vmem>>, vector<128x128xf32>
    %cst_26 = arith.constant dense<0.000000e+00> : vector<2x128xf32>
    %48 = tpu.matmul %46, %47, %cst_26 {dimension_numbers = #tpu.dot_dimension_numbers<[1], [0], [0], [1], [0, 0, 1, 1], [], []>} : vector<2x128xf32>, vector<128x128xf32>, vector<2x128xf32> -> vector<2x128xf32>
    %cst_27 = arith.constant 0.001953125 : f32
    %49 = vector.broadcast %cst_27 : f32 to vector<2x128xf32>
    %50 = arith.mulf %48, %49 : vector<2x128xf32>
    %51 = vector.extract_strided_slice %50 {offsets = [0, 0], sizes = [1, 128], strides = [1, 1]} : vector<2x128xf32> to vector<1x128xf32>
    %52 = vector.extract_strided_slice %50 {offsets = [1, 0], sizes = [1, 128], strides = [1, 1]} : vector<2x128xf32> to vector<1x128xf32>
    %53 = arith.mulf %51, %51 : vector<1x128xf32>
    %54 = arith.subf %52, %53 : vector<1x128xf32>
    %cst_28 = arith.constant 9.99999974E-6 : f32
    %55 = vector.broadcast %cst_28 : f32 to vector<1x128xf32>
    %56 = arith.addf %54, %55 : vector<1x128xf32>
    %57 = math.rsqrt %56 : vector<1x128xf32>
    %58 = arith.mulf %39, %57 : vector<1x128xf32>
    %59 = vector.broadcast %58 : vector<1x128xf32> to vector<32x128xf32>
    %60 = arith.mulf %38, %59 : vector<32x128xf32>
    %61 = arith.mulf %51, %58 : vector<1x128xf32>
    %62 = arith.subf %40, %61 : vector<1x128xf32>
    %63 = vector.broadcast %62 : vector<1x128xf32> to vector<32x128xf32>
    %64 = arith.addf %60, %63 : vector<32x128xf32>
    %cst_29 = arith.constant 0.000000e+00 : f32
    %65 = vector.broadcast %cst_29 : f32 to vector<32x128xf32>
    %66 = arith.maximumf %64, %65 : vector<32x128xf32>
    %c0_30 = arith.constant 0 : index
    %c0_31 = arith.constant 0 : index
    %67 = vector.load %arg2[%c0_30, %c0_31] : memref<64x32xf32, #tpu.memory_space<vmem>>, vector<64x32xf32>
    %cst_32 = arith.constant dense<0.000000e+00> : vector<64x128xf32>
    %68 = tpu.matmul %67, %66, %cst_32 {dimension_numbers = #tpu.dot_dimension_numbers<[1], [0], [0], [1], [0, 0, 1, 1], [], []>} : vector<64x32xf32>, vector<32x128xf32>, vector<64x128xf32> -> vector<64x128xf32>
    %69 = vector.extract_strided_slice %68 {offsets = [0, 0], sizes = [32, 128], strides = [1, 1]} : vector<64x128xf32> to vector<32x128xf32>
    %70 = vector.extract_strided_slice %68 {offsets = [32, 0], sizes = [32, 128], strides = [1, 1]} : vector<64x128xf32> to vector<32x128xf32>
    %71 = tpu.concatenate %69, %66, %70 in 1 : vector<32x128xf32>, vector<32x128xf32>, vector<32x128xf32> -> vector<32x384xf32>
    %c0_33 = arith.constant 0 : index
    %c0_34 = arith.constant 0 : index
    %72 = vector.load %arg5[%c0_33, %c0_34] : memref<384x128xf32, #tpu.memory_space<vmem>>, vector<384x128xf32>
    %cst_35 = arith.constant dense<0.000000e+00> : vector<32x128xf32>
    %73 = tpu.matmul %71, %72, %cst_35 {dimension_numbers = #tpu.dot_dimension_numbers<[1], [0], [0], [1], [0, 0, 1, 1], [], []>} : vector<32x384xf32>, vector<384x128xf32>, vector<32x128xf32> -> vector<32x128xf32>
    %c4 = arith.constant 4 : index
    %c0_36 = arith.constant 0 : index
    %74 = vector.load %arg6[%c4, %c0_36] : memref<8x128xf32, #tpu.memory_space<vmem>>, vector<1x128xf32>
    %c5 = arith.constant 5 : index
    %c0_37 = arith.constant 0 : index
    %75 = vector.load %arg6[%c5, %c0_37] : memref<8x128xf32, #tpu.memory_space<vmem>>, vector<1x128xf32>
    %cst_38 = arith.constant dense<0.000000e+00> : vector<128xf32>
    %76 = vector.multi_reduction <add>, %73, %cst_38 [0] : vector<32x128xf32> to vector<128xf32>
    %77 = vector.shape_cast %76 : vector<128xf32> to vector<1x128xf32>
    %78 = arith.mulf %73, %73 : vector<32x128xf32>
    %cst_39 = arith.constant dense<0.000000e+00> : vector<128xf32>
    %79 = vector.multi_reduction <add>, %78, %cst_39 [0] : vector<32x128xf32> to vector<128xf32>
    %80 = vector.shape_cast %79 : vector<128xf32> to vector<1x128xf32>
    %81 = tpu.concatenate %77, %80 in 0 : vector<1x128xf32>, vector<1x128xf32> -> vector<2x128xf32>
    %c0_40 = arith.constant 0 : index
    %c0_41 = arith.constant 0 : index
    %82 = vector.load %arg3[%c0_40, %c0_41] : memref<128x128xf32, #tpu.memory_space<vmem>>, vector<128x128xf32>
    %cst_42 = arith.constant dense<0.000000e+00> : vector<2x128xf32>
    %83 = tpu.matmul %81, %82, %cst_42 {dimension_numbers = #tpu.dot_dimension_numbers<[1], [0], [0], [1], [0, 0, 1, 1], [], []>} : vector<2x128xf32>, vector<128x128xf32>, vector<2x128xf32> -> vector<2x128xf32>
    %cst_43 = arith.constant 0.001953125 : f32
    %84 = vector.broadcast %cst_43 : f32 to vector<2x128xf32>
    %85 = arith.mulf %83, %84 : vector<2x128xf32>
    %86 = vector.extract_strided_slice %85 {offsets = [0, 0], sizes = [1, 128], strides = [1, 1]} : vector<2x128xf32> to vector<1x128xf32>
    %87 = vector.extract_strided_slice %85 {offsets = [1, 0], sizes = [1, 128], strides = [1, 1]} : vector<2x128xf32> to vector<1x128xf32>
    %88 = arith.mulf %86, %86 : vector<1x128xf32>
    %89 = arith.subf %87, %88 : vector<1x128xf32>
    %cst_44 = arith.constant 9.99999974E-6 : f32
    %90 = vector.broadcast %cst_44 : f32 to vector<1x128xf32>
    %91 = arith.addf %89, %90 : vector<1x128xf32>
    %92 = math.rsqrt %91 : vector<1x128xf32>
    %93 = arith.mulf %74, %92 : vector<1x128xf32>
    %94 = vector.broadcast %93 : vector<1x128xf32> to vector<32x128xf32>
    %95 = arith.mulf %73, %94 : vector<32x128xf32>
    %96 = arith.mulf %86, %93 : vector<1x128xf32>
    %97 = arith.subf %75, %96 : vector<1x128xf32>
    %98 = vector.broadcast %97 : vector<1x128xf32> to vector<32x128xf32>
    %99 = arith.addf %95, %98 : vector<32x128xf32>
    %100 = vector.extract_strided_slice %2 {offsets = [0, 128], sizes = [32, 128], strides = [1, 1]} : vector<32x256xf32> to vector<32x128xf32>
    %c6 = arith.constant 6 : index
    %c0_45 = arith.constant 0 : index
    %101 = vector.load %arg6[%c6, %c0_45] : memref<8x128xf32, #tpu.memory_space<vmem>>, vector<1x128xf32>
    %c7 = arith.constant 7 : index
    %c0_46 = arith.constant 0 : index
    %102 = vector.load %arg6[%c7, %c0_46] : memref<8x128xf32, #tpu.memory_space<vmem>>, vector<1x128xf32>
    %cst_47 = arith.constant dense<0.000000e+00> : vector<128xf32>
    %103 = vector.multi_reduction <add>, %100, %cst_47 [0] : vector<32x128xf32> to vector<128xf32>
    %104 = vector.shape_cast %103 : vector<128xf32> to vector<1x128xf32>
    %105 = arith.mulf %100, %100 : vector<32x128xf32>
    %cst_48 = arith.constant dense<0.000000e+00> : vector<128xf32>
    %106 = vector.multi_reduction <add>, %105, %cst_48 [0] : vector<32x128xf32> to vector<128xf32>
    %107 = vector.shape_cast %106 : vector<128xf32> to vector<1x128xf32>
    %108 = tpu.concatenate %104, %107 in 0 : vector<1x128xf32>, vector<1x128xf32> -> vector<2x128xf32>
    %c0_49 = arith.constant 0 : index
    %c0_50 = arith.constant 0 : index
    %109 = vector.load %arg3[%c0_49, %c0_50] : memref<128x128xf32, #tpu.memory_space<vmem>>, vector<128x128xf32>
    %cst_51 = arith.constant dense<0.000000e+00> : vector<2x128xf32>
    %110 = tpu.matmul %108, %109, %cst_51 {dimension_numbers = #tpu.dot_dimension_numbers<[1], [0], [0], [1], [0, 0, 1, 1], [], []>} : vector<2x128xf32>, vector<128x128xf32>, vector<2x128xf32> -> vector<2x128xf32>
    %cst_52 = arith.constant 0.001953125 : f32
    %111 = vector.broadcast %cst_52 : f32 to vector<2x128xf32>
    %112 = arith.mulf %110, %111 : vector<2x128xf32>
    %113 = vector.extract_strided_slice %112 {offsets = [0, 0], sizes = [1, 128], strides = [1, 1]} : vector<2x128xf32> to vector<1x128xf32>
    %114 = vector.extract_strided_slice %112 {offsets = [1, 0], sizes = [1, 128], strides = [1, 1]} : vector<2x128xf32> to vector<1x128xf32>
    %115 = arith.mulf %113, %113 : vector<1x128xf32>
    %116 = arith.subf %114, %115 : vector<1x128xf32>
    %cst_53 = arith.constant 9.99999974E-6 : f32
    %117 = vector.broadcast %cst_53 : f32 to vector<1x128xf32>
    %118 = arith.addf %116, %117 : vector<1x128xf32>
    %119 = math.rsqrt %118 : vector<1x128xf32>
    %120 = arith.mulf %101, %119 : vector<1x128xf32>
    %121 = vector.broadcast %120 : vector<1x128xf32> to vector<32x128xf32>
    %122 = arith.mulf %100, %121 : vector<32x128xf32>
    %123 = arith.mulf %113, %120 : vector<1x128xf32>
    %124 = arith.subf %102, %123 : vector<1x128xf32>
    %125 = vector.broadcast %124 : vector<1x128xf32> to vector<32x128xf32>
    %126 = arith.addf %122, %125 : vector<32x128xf32>
    %127 = arith.addf %99, %126 : vector<32x128xf32>
    %cst_54 = arith.constant 0.000000e+00 : f32
    %128 = vector.broadcast %cst_54 : f32 to vector<32x128xf32>
    %129 = arith.maximumf %127, %128 : vector<32x128xf32>
    %c0_55 = arith.constant 0 : index
    %c0_56 = arith.constant 0 : index
    %130 = vector.load %arg7[%c0_55, %c0_56] : memref<32x128xf32, #tpu.memory_space<vmem>>, vector<32x128xf32>
    tpu.vector_store %arg7[%c0_55, %c0_56], %129 {strides = array<i32>} : memref<32x128xf32, #tpu.memory_space<vmem>>, vector<32x128xf32>,
    return
  }
}

</mosaic_0001>

<bundles_post_ra>
// kernel: tpu_custom_call.1
= control target key start
LH: loop header
LB: loop body
LE: loop exit
PB: predicated region body
PF: predicated region fallthrough
CT: control target
= control target key end

     0   :  { %12 = vsyncpa [#allocation3], 0  ;;  %s2538_s0 = inlined_call_operand.vmem [shape: f32[32,64], index: 0, kind: input, shape index: {}]   ;;  %s2539_s1 = inlined_call_operand.hbm [shape: f32[64,256], index: 1, kind: input, shape index: {}]   ;;  %s2540_s2 = inlined_call_operand.vmem [shape: f32[64,32], index: 2, kind: input, shape index: {}]   ;;  %s2541_s3 = inlined_call_operand.hbm [shape: f32[128,128], index: 3, kind: input, shape index: {}]   ;;  %s2542_s4 = inlined_call_operand.hbm [shape: f32[384,128], index: 4, kind: input, shape index: {}]   ;;  %s2543_s5 = inlined_call_operand.hbm [shape: f32[384,128], index: 5, kind: input, shape index: {}]   ;;  %s2544_s6 = inlined_call_operand.vmem [shape: f32[8,128], index: 6, kind: input, shape index: {}]   ;;  %s2545_s7 = inlined_call_operand.hbm [shape: f32[32,128], index: 7, kind: output, shape index: {}]  }
   0x1   :  { %13 = vsyncpa [#allocation6], 0 }
   0x2   :  { %14 = vsyncpa [#allocation9], 0 }
   0x3   :  { %15 = vsyncpa [#allocation4], 0  ;;  %s2078_s24 = smov [#allocation5]  }
   0x4   :  { %s37_s25 = sshll.u32 %s2078_s24, 4  ;;  %s38_s25 = int_to_ptr.vmem [resolvable:$true] %s37_s25 }
   0x5   :  { %s1978_s26 = scalar_lea.vmem %s38_s25, 2048  ;;  %p1983_p1 = scmp.lt.s32.totalorder %s38_s25, %s38_s25 }
   0x6   :  { %p1979_p0 = scmp.ne.s32.totalorder %s38_s25, %s1978_s26  ;;  %p1984_p2 = scmp.lt.s32.totalorder %s1978_s26, %s1978_s26 }
   0x8   :  { %p1985_p3 = por %p1984_p2, %p1983_p1 }
   0xa   :  { %p1986_p4 = pnand %p1985_p3, %p1979_p0 }
   0xc   :  { %1989 = shalt.err (!%p1986_p4)
}
   0xd   :  { %s2079_s27 = smov 128   ;;  %s2080_s28 = smov 8  }
   0xe   :  { %43 = dma.hbm_to_vmem [thread:$0]  %s2541_s3, 2048, %s38_s25, [#allocation6], %s2079_s27, %s2079_s27, %s2080_s28  }
   0xf   :  { %s2081_s8 = smov [#allocation2]  }
  0x10   :  { %s23_s9 = sshll.u32 %s2081_s8, 4  ;;  %s24_s9 = int_to_ptr.vmem [resolvable:$true] %s23_s9 }
  0x11   :  { %s1998_s10 = scalar_lea.vmem %s24_s9, 2048  ;;  %p2003_p6 = scmp.lt.s32.totalorder %s24_s9, %s24_s9 }
  0x12   :  { %p1999_p5 = scmp.ne.s32.totalorder %s24_s9, %s1998_s10  ;;  %p2004_p7 = scmp.lt.s32.totalorder %s1998_s10, %s1998_s10 }
  0x14   :  { %p2005_p8 = por %p2004_p7, %p2003_p6 }
  0x16   :  { %p2006_p9 = pnand %p2005_p8, %p1999_p5 }
  0x18   :  { %2009 = shalt.err (!%p2006_p9)
}
  0x19   :  { %s2082_s11 = smov 256   ;;  %s2083_s12 = smov 16  }
  0x1a   :  { %29 = dma.hbm_to_vmem [thread:$0]  %s2539_s1, 2048, %s24_s9, [#allocation3], %s2082_s11, %s2082_s11, %s2083_s12  }
  0x1b   :  { %s2084_s15 = smov [#allocation7]   ;;  %s2085_s17 = smov [#allocation8]  }
  0x1c   :  { %s49_s16 = sshll.u32 %s2084_s15, 4  ;;  %s61_s3 = sshll.u32 %s2085_s17, 4  ;;  %s50_s16 = int_to_ptr.vmem [resolvable:$true] %s49_s16  ;;  %s62_s3 = int_to_ptr.vmem [resolvable:$true] %s61_s3 }
  0x1d   :  { %s2018_s18 = scalar_lea.vmem %s50_s16, 6144  ;;  %p2023_p11 = scmp.lt.s32.totalorder %s50_s16, %s50_s16 }
  0x1e   :  { %p2019_p10 = scmp.ne.s32.totalorder %s50_s16, %s2018_s18  ;;  %p2024_p12 = scmp.lt.s32.totalorder %s2018_s18, %s2018_s18 }
  0x20   :  { %p2025_p13 = por %p2024_p12, %p2023_p11 }
  0x22   :  { %p2026_p0 = pnand %p2025_p13, %p2019_p10 }
  0x24   :  { %2029 = shalt.err (!%p2026_p0)
}
  0x25   :  { %55 = dma.hbm_to_vmem [thread:$0]  %s2542_s4, 6144, %s50_s16, [#allocation6], %s2079_s27, %s2079_s27, %s2080_s28  }
  0x26   :  { %s2038_s1 = scalar_lea.vmem %s62_s3, 6144  ;;  %p2043_p2 = scmp.lt.s32.totalorder %s62_s3, %s62_s3 }
  0x27   :  { %p2039_p1 = scmp.ne.s32.totalorder %s62_s3, %s2038_s1  ;;  %p2044_p3 = scmp.lt.s32.totalorder %s2038_s1, %s2038_s1 }
  0x29   :  { %p2045_p4 = por %p2044_p3, %p2043_p2 }
  0x2b   :  { %p2046_p5 = pnand %p2045_p4, %p2039_p1 }
  0x2d   :  { %2049 = shalt.err (!%p2046_p5)
}
  0x2e   :  { %67 = dma.hbm_to_vmem [thread:$0]  %s2543_s5, 6144, %s62_s3, [#allocation9], %s2079_s27, %s2079_s27, %s2080_s28  }
  0x2f   :  { %2070 = dma.done.wait [#allocation3], 2048  }
  0x30   :  { %2071 = vsyncadd [#allocation3], 4294965248 }
  0x31   :  { %2072 = dma.done.wait [#allocation6], 8192  }
  0x32   :  { %2073 = vsyncadd [#allocation6], 4294959104 }
  0x33   :  { %2074 = dma.done.wait [#allocation9], 6144  }
  0x34   :  { %2075 = vsyncadd [#allocation9], 4294961152  ;;  %v2086_v0 = vmov 0.0   ;;  %v101_v1 = vld [vmem:[#allocation2 + $0x78] sm:$0xff]  ;;  %v100_v2 = vld [vmem:[#allocation2 + $0x70] sm:$0xff]  ;;  %vm102_vm0 = vcmask 523264  }
  0x35   :  { %179 = vmatprep.mubr.f32.mxu0 %v2086_v0  ;;  %1679 = vmatprep.subr.mxu1 %v2086_v0  ;;  %v99_v3 = vld [vmem:[#allocation2 + $0x68] sm:$0xff]  ;;  %v98_v4 = vld [vmem:[#allocation2 + $0x60] sm:$0xff]  ;;  %v97_v5 = vld [vmem:[#allocation2 + $0x58] sm:$0xff]  ;;  %vm2087_vm1 = vmmov 0   ;;  %vm228_vm2 = vcmask 1040384   ;;  %vm358_vm3 = vcmask 261120  }
  0x36   :  { %131 = vmatprep.subr.mxu0 %v101_v1  ;;  %v96_v6 = vld [vmem:[#allocation2 + $0x50] sm:$0xff]  ;;  %v95_v7 = vld [vmem:[#allocation2 + $0x48] sm:$0xff]  ;;  %v94_v8 = vld [vmem:[#allocation2 + $0x40] sm:$0xff]  ;;  %1711 = vmatprep.mubr.msk.f32.mxu1 %vm2087_vm1, %v2086_v0 }
  0x37   :  { %132 = vmatpush1.msra.mxu0 %v100_v2  ;;  %v93_v9 = vld [vmem:[#allocation2 + $0x38] sm:$0xff]  ;;  %v92_v11 = vld [vmem:[#allocation2 + $0x30] sm:$0xff]  ;;  %v91_v12 = vld [vmem:[#allocation2 + $0x28] sm:$0xff] }
  0x38   :  { %133 = vmatprep.subr.mxu0 %v99_v3  ;;  %v2152_v10 = vld [vmem:[#allocation5 + $0x78] sm:$0xff]  ;;  %v90_v13 = vld [vmem:[#allocation2 + $0x20] sm:$0xff]  ;;  %v88_v15 = vld [vmem:[#allocation2 + $0x10] sm:$0xff] }
  0x39   :  { %134 = vmatpush1.msra.mxu0 %v98_v4  ;;  %1680 = vmatpush3.msra.mxu1 %v2152_v10  ;;  %v89_v14 = vld [vmem:[#allocation2 + $0x18] sm:$0xff]  ;;  %v87_v16 = vld [vmem:[#allocation2 + $0x8] sm:$0xff]  ;;  %v86_v17 = vld [vmem:[#allocation2] sm:$0xff] }
  0x3a   :  { %135 = vmatprep.subr.mxu0 %v97_v5  ;;  %1681 = vmatprep.subr.mxu1 %v2086_v0  ;;  %v82_v18 = vld [vmem:[%s2538_s0] sm:$0xff]  ;;  %v83_v19 = vld [vmem:[%s2538_s0 + $0x8] sm:$0xff]  ;;  %v84_v20 = vld [vmem:[%s2538_s0 + $0x10] sm:$0xff] }
  0x3b   :  { %136 = vmatpush1.msra.mxu0 %v96_v6  ;;  %v85_v21 = vld [vmem:[%s2538_s0 + $0x18] sm:$0xff]  ;;  %v2171_v22 = vld [vmem:[#allocation5 + $0x70] sm:$0xff]  ;;  %v2175_v23 = vld [vmem:[#allocation5 + $0x68] sm:$0xff] }
  0x3c   :  { %137 = vmatprep.subr.mxu0 %v95_v7  ;;  %1682 = vmatpush3.msra.mxu1 %v2171_v22  ;;  %v2179_v24 = vld [vmem:[#allocation5 + $0x60] sm:$0xff]  ;;  %v2183_v25 = vld [vmem:[#allocation5 + $0x58] sm:$0xff]  ;;  %v2187_v26 = vld [vmem:[#allocation5 + $0x50] sm:$0xff] }
  0x3d   :  { %138 = vmatpush1.msra.mxu0 %v94_v8  ;;  %1683 = vmatprep.subr.mxu1 %v2086_v0  ;;  %v2191_v27 = vld [vmem:[#allocation5 + $0x48] sm:$0xff]  ;;  %v2195_v28 = vld [vmem:[#allocation5 + $0x40] sm:$0xff]  ;;  %v2199_v29 = vld [vmem:[#allocation5 + $0x38] sm:$0xff] }
  0x3e   :  { %139 = vmatprep.subr.mxu0 %v93_v9  ;;  %1684 = vmatpush3.msra.mxu1 %v2175_v23  ;;  %v2203_v30 = vld [vmem:[#allocation5 + $0x30] sm:$0xff]  ;;  %v2207_v31 = vld [vmem:[#allocation5 + $0x28] sm:$0xff]  ;;  %v2211_v32 = vld [vmem:[#allocation5 + $0x20] sm:$0xff] }
  0x3f   :  { %140 = vmatpush1.msra.mxu0 %v92_v11  ;;  %1685 = vmatprep.subr.mxu1 %v2086_v0  ;;  %v2215_v33 = vld [vmem:[#allocation5 + $0x18] sm:$0xff]  ;;  %v2219_v34 = vld [vmem:[#allocation5 + $0x10] sm:$0xff]  ;;  %v2223_v35 = vld [vmem:[#allocation5 + $0x8] sm:$0xff] }
  0x40   :  { %141 = vmatprep.subr.mxu0 %v91_v12  ;;  %1686 = vmatpush3.msra.mxu1 %v2179_v24  ;;  %v2226_v36 = vld [vmem:[#allocation5] sm:$0xff]  ;;  %v519_v5 = vld [vmem:[#allocation7 + $0xf8] sm:$0xff]  ;;  %v518_v7 = vld [vmem:[#allocation7 + $0xf0] sm:$0xff] }
  0x41   :  { %142 = vmatpush1.msra.mxu0 %v90_v13  ;;  %1687 = vmatprep.subr.mxu1 %v2086_v0  ;;  %v2262_v4 = vld [vmem:[%s2540_s2] sm:$0xff]  ;;  %v503_v6 = vld [vmem:[#allocation7 + $0x78] sm:$0xff]  ;;  %v502_v8 = vld [vmem:[#allocation7 + $0x70] sm:$0xff] }
  0x42   :  { %143 = vmatprep.subr.mxu0 %v89_v14  ;;  %1688 = vmatpush3.msra.mxu1 %v2183_v25  ;;  %v517_v9 = vld [vmem:[#allocation7 + $0xe8] sm:$0xff]  ;;  %v516_v12 = vld [vmem:[#allocation7 + $0xe0] sm:$0xff]  ;;  %v515_v14 = vld [vmem:[#allocation7 + $0xd8] sm:$0xff] }
  0x43   :  { %144 = vmatpush1.msra.mxu0 %v88_v15  ;;  %1689 = vmatprep.subr.mxu1 %v2086_v0  ;;  %v501_v11 = vld [vmem:[#allocation7 + $0x68] sm:$0xff]  ;;  %v500_v13 = vld [vmem:[#allocation7 + $0x60] sm:$0xff]  ;;  %v499_v15 = vld [vmem:[#allocation7 + $0x58] sm:$0xff] }
  0x44   :  { %145 = vmatprep.subr.mxu0 %v87_v16  ;;  %1690 = vmatpush3.msra.mxu1 %v2187_v26  ;;  %v514_v16 = vld [vmem:[#allocation7 + $0xd0] sm:$0xff] }
  0x45   :  { %146 = vmatpush1.msra.mxu0 %v86_v17  ;;  %1691 = vmatprep.subr.mxu1 %v2086_v0  ;;  %v498_v17 = vld [vmem:[#allocation7 + $0x50] sm:$0xff] }
  0x46   :  { %1439 = vmatmul.mubr.msk.f32.vlgmr.msra.gmra.mxu0 %vm102_vm0, %v82_v18  ;;  %1692 = vmatpush3.msra.mxu1 %v2191_v27  ;;  %v513_v18 = vld [vmem:[#allocation7 + $0xc8] sm:$0xff] }
  0x47   :  { %185 = vmatprep.mubr.f32.mxu0 %v2086_v0  ;;  %1693 = vmatprep.subr.mxu1 %v2086_v0 }
  0x48   :  { %1694 = vmatpush3.msra.mxu1 %v2195_v28  ;;  %1488 = vmatprep.subr.mxu0 %v519_v5  ;;  %v204_v5 = vld [vmem:[%s2544_s6] sm:$0x1] }
  0x49   :  { %1695 = vmatprep.subr.mxu1 %v2086_v0  ;;  %1489 = vmatpush3.msra.mxu0 %v503_v6 }
  0x4a   :  { %1440 = vmatmul.mubr.msk.f32.gmra.mxu0 %vm102_vm0, %v83_v19  ;;  %1696 = vmatpush3.msra.mxu1 %v2199_v29  ;;  %v497_v19 = vld [vmem:[#allocation7 + $0x48] sm:$0xff] }
  0x4b   :  { %191 = vmatprep.mubr.f32.mxu0 %v2086_v0  ;;  %1697 = vmatprep.subr.mxu1 %v2086_v0 }
  0x4c   :  { %1698 = vmatpush3.msra.mxu1 %v2203_v30  ;;  %1490 = vmatprep.subr.mxu0 %v518_v7 }
  0x4d   :  { %1699 = vmatprep.subr.mxu1 %v2086_v0  ;;  %1491 = vmatpush3.msra.mxu0 %v502_v8 }
  0x4e   :  { %1441 = vmatmul.mubr.msk.f32.gmra.mxu0 %vm102_vm0, %v84_v20  ;;  %1700 = vmatpush3.msra.mxu1 %v2207_v31  ;;  %v512_v20 = vld [vmem:[#allocation7 + $0xc0] sm:$0xff] }
  0x4f   :  { %197 = vmatprep.mubr.f32.mxu0 %v2086_v0  ;;  %1701 = vmatprep.subr.mxu1 %v2086_v0 }
  0x50   :  { %1702 = vmatpush3.msra.mxu1 %v2211_v32  ;;  %1492 = vmatprep.subr.mxu0 %v517_v9  ;;  %v205_v9 = vld [vmem:[%s2544_s6 + $0x1] sm:$0x1] }
  0x51   :  { %1703 = vmatprep.subr.mxu1 %v2086_v0  ;;  %1493 = vmatpush3.msra.mxu0 %v501_v11 }
  0x52   :  { %1442 = vmatmul.mubr.msk.f32.gmra.mxu0 %vm102_vm0, %v85_v21  ;;  %1704 = vmatpush3.msra.mxu1 %v2215_v33  ;;  %v496_v21 = vld [vmem:[#allocation7 + $0x40] sm:$0xff] }
  0x53   :  { %1705 = vmatprep.subr.mxu1 %v2086_v0  ;;  %1494 = vmatprep.subr.mxu0 %v516_v12 }
  0x54   :  { %1706 = vmatpush3.msra.mxu1 %v2219_v34  ;;  %1495 = vmatpush3.msra.mxu0 %v500_v13 }
  0x55   :  { %1707 = vmatprep.subr.mxu1 %v2086_v0  ;;  %1496 = vmatprep.subr.mxu0 %v515_v14 }
  0x56   :  { %1708 = vmatpush3.msra.mxu1 %v2223_v35  ;;  %1497 = vmatpush3.msra.mxu0 %v499_v15 }
  0x57   :  { %1709 = vmatprep.subr.mxu1 %v2086_v0  ;;  %1498 = vmatprep.subr.mxu0 %v514_v16 }
  0x58   :  { %1710 = vmatpush3.msra.mxu1 %v2226_v36  ;;  %1499 = vmatpush3.msra.mxu0 %v498_v17 }
  0x59   :  { %1500 = vmatprep.subr.mxu0 %v513_v18 }
  0x5a   :  { %1501 = vmatpush3.msra.mxu0 %v497_v19 }
  0x5b   :  { %1502 = vmatprep.subr.mxu0 %v512_v20 }
  0x5c   :  { %1503 = vmatpush3.msra.mxu0 %v496_v21 }
 0x106   :  { %v2232_v37 = vpop.f32.mrf.mxu0 }
 0x107   :  { %v215_v43 = vmul.f32 %v2232_v37, %v2232_v37 }
 0x108   :  { %v2234_v38 = vpop.f32.mrf.mxu0 }
 0x10a   :  { %v2236_v39 = vpop.f32.mrf.mxu0 }
 0x10b   :  { %v216_v41 = vmul.f32 %v2236_v39, %v2236_v39  ;;  %v206_v44 = vadd.f32 %v2236_v39, %v2232_v37 }
 0x10c   :  { %v2238_v40 = vpop.f32.mrf.mxu0 }
 0x10d   :  { %v219_v47 = vadd.f32 %v216_v41, %v215_v43  ;;  %v511_v41 = vld [vmem:[#allocation7 + $0xb8] sm:$0xff] }
 0x10e   :  { %v2242_v42 = vpop.f32.mrf.mxu0  ;;  %v495_v43 = vld [vmem:[#allocation7 + $0x38] sm:$0xff]  ;;  %1504 = vmatprep.subr.mxu0 %v511_v41 }
 0x10f   :  { %v217_v45 = vmul.f32 %v2242_v42, %v2242_v42  ;;  %v207_v48 = vadd.f32 %v206_v44, %v2242_v42  ;;  %v510_v44 = vld [vmem:[#allocation7 + $0xb0] sm:$0xff]  ;;  %1505 = vmatpush3.msra.mxu0 %v495_v43 }
 0x110   :  { %v2250_v46 = vpop.f32.mrf.mxu0  ;;  %1506 = vmatprep.subr.mxu0 %v510_v44 }
 0x111   :  { %v220_v50 = vadd.f32 %v219_v47, %v217_v45  ;;  %v494_v45 = vld [vmem:[#allocation7 + $0x30] sm:$0xff]  ;;  %v509_v47 = vld [vmem:[#allocation7 + $0xa8] sm:$0xff] }
 0x112   :  { %v2253_v49 = vpop.f32.mrf.mxu0  ;;  %1507 = vmatpush3.msra.mxu0 %v494_v45 }
 0x113   :  { %v208_v51 = vadd.f32 %v207_v48, %v2253_v49  ;;  %v218_v52 = vmul.f32 %v2253_v49, %v2253_v49  ;;  %v493_v48 = vld [vmem:[#allocation7 + $0x28] sm:$0xff]  ;;  %1508 = vmatprep.subr.mxu0 %v509_v47  ;;  %v534_v47 = vld [vmem:[#allocation7 + $0x170] sm:$0xff] }
 0x114   :  { %1509 = vmatpush3.msra.mxu0 %v493_v48  ;;  %v2309_v48 = vld [vmem:[%s2540_s2 + $0x18] sm:$0xff] }
 0x115   :  { %v209_v53 = vrot.slane %v208_v51, 4  ;;  %v221_v54 = vadd.f32 %v220_v50, %v218_v52  ;;  %v508_v50 = vld [vmem:[#allocation7 + $0xa0] sm:$0xff]  ;;  %v507_v52 = vld [vmem:[#allocation7 + $0x98] sm:$0xff] }
 0x116   :  { %1510 = vmatprep.subr.mxu0 %v508_v50  ;;  %v533_v50 = vld [vmem:[#allocation7 + $0x168] sm:$0xff] }
 0x117   :  { %v210_v55 = vadd.f32 %v209_v53, %v208_v51  ;;  %v222_v56 = vrot.slane %v221_v54, 4  ;;  %v492_v51 = vld [vmem:[#allocation7 + $0x20] sm:$0xff]  ;;  %v491_v53 = vld [vmem:[#allocation7 + $0x18] sm:$0xff] }
 0x118   :  { %1511 = vmatpush3.msra.mxu0 %v492_v51  ;;  %v2314_v51 = vld [vmem:[%s2540_s2 + $0x20] sm:$0xff] }
 0x119   :  { %v211_v57 = vrot.slane %v210_v55, 2  ;;  %v223_v58 = vadd.f32 %v222_v56, %v221_v54  ;;  %v506_v54 = vld [vmem:[#allocation7 + $0x90] sm:$0xff]  ;;  %1512 = vmatprep.subr.mxu0 %v507_v52  ;;  %v505_v56 = vld [vmem:[#allocation7 + $0x88] sm:$0xff]  ;;  %v532_v52 = vld [vmem:[#allocation7 + $0x160] sm:$0xff] }
 0x11a   :  { %1513 = vmatpush3.msra.mxu0 %v491_v53  ;;  %v2323_v53 = vld [vmem:[%s2540_s2 + $0x28] sm:$0xff] }
 0x11b   :  { %v212_v59 = vadd.f32 %v211_v57, %v210_v55  ;;  %v224_v60 = vrot.slane %v223_v58, 2  ;;  %v490_v55 = vld [vmem:[#allocation7 + $0x10] sm:$0xff]  ;;  %1514 = vmatprep.subr.mxu0 %v506_v54  ;;  %v531_v54 = vld [vmem:[#allocation7 + $0x158] sm:$0xff] }
 0x11c   :  { %1515 = vmatpush3.msra.mxu0 %v490_v55  ;;  %v2328_v55 = vld [vmem:[%s2540_s2 + $0x30] sm:$0xff] }
 0x11d   :  { %v213_v61 = vrot.slane %v212_v59, 1  ;;  %v225_v62 = vadd.f32 %v224_v60, %v223_v58  ;;  %1516 = vmatprep.subr.mxu0 %v505_v56  ;;  %v530_v56 = vld [vmem:[#allocation7 + $0x150] sm:$0xff] }
 0x11f   :  { %v226_v63 = vrot.slane %v225_v62, 1  ;;  %v214_v1 = vadd.f32 %v213_v61, %v212_v59 }
 0x121   :  { %v227_v2 = vadd.f32 %v226_v63, %v225_v62 }
 0x123   :  { %v229_v3 = vsel %vm228_vm2, %v214_v1, %v227_v2  ;;  %v328_v1 = vlaneseq }
 0x124   :  { %1712 = vmatmul.mubr.f32.vlgmr.msra.gmra.mxu1 %v229_v3 }
 0x125   :  { %1722 = vmatprep.mubr.msk.f32.mxu1 %vm358_vm3, %v2262_v4  ;;  %v329_v2 = vshrl.u32 %v328_v1, 7  ;;  %v504_v1 = vld [vmem:[#allocation7 + $0x80] sm:$0xff] }
 0x127   :  { %v2269_v7 = vsub.s32 0, %v329_v2  ;;  %v488_v2 = vld [vmem:[#allocation7] sm:$0xff] }
 0x1e4   :  { %v312_v57 = vpop.f32.mrf.mxu1 }
 0x1e5   :  { %v316_v58 = vmul.f32 0.001953125, %v312_v57  ;;  %v2337_v57 = vld [vmem:[%s2540_s2 + $0x38] sm:$0xff] }
 0x1e6   :  { %v1713_v59 = vpop.f32.mrf.mxu1 }
 0x1e7   :  { %v317_v60 = vmul.f32 %v316_v58, %v316_v58  ;;  %v528_v59 = vld [vmem:[#allocation7 + $0x140] sm:$0xff] }
 0x1e9   :  { %v319_v61 = vrot.slane %v317_v60, 7  ;;  %v527_v60 = vld [vmem:[#allocation7 + $0x138] sm:$0xff] }
 0x1eb   :  { %v321_v62 = vsub.f32 %v316_v58, %v319_v61  ;;  %v526_v61 = vld [vmem:[#allocation7 + $0x130] sm:$0xff] }
 0x1ed   :  { %v322_v63 = vadd.f32 1e-05, %v321_v62  ;;  %v489_v62 = vld [vmem:[#allocation7 + $0x8] sm:$0xff] }
 0x1ee   :  { %1517 = vmatpush3.msra.mxu0 %v489_v62 }
 0x1ef   :  { %1946 = vrsqrt.f32 %v322_v63  ;;  %v525_v63 = vld [vmem:[#allocation7 + $0x128] sm:$0xff]  ;;  %1518 = vmatprep.subr.mxu0 %v504_v1 }
 0x1f0   :  { %1519 = vmatpush3.msra.mxu0 %v488_v2 }
 0x1f1   :  { %1772 = vmatprep.subr.mxu0 %v2086_v0 }
 0x1fc   :  { %v1947_v3 = vpop.eup %1946 }
 0x1fd   :  { %v325_v6 = vrot.slane %v1947_v3, 1  ;;  %v524_v3 = vld [vmem:[#allocation7 + $0x120] sm:$0xff] }
 0x1ff   :  { %v327_v8 = vmul.f32 %v325_v6, %v204_v5  ;;  %v523_v5 = vld [vmem:[#allocation7 + $0x118] sm:$0xff]  ;;  %v522_v6 = vld [vmem:[#allocation7 + $0x110] sm:$0xff] }
 0x201   :  { %v331_v11 = vrot.slane %v327_v8, %v2269_v7  ;;  %v336_v12 = vmul.f32 %v327_v8, %v316_v58  ;;  %v529_v58 = vld [vmem:[#allocation7 + $0x148] sm:$0xff] }
 0x202   :  { %v521_v8 = vld [vmem:[#allocation7 + $0x108] sm:$0xff] }
 0x203   :  { %v337_v13 = vsub.f32 %v205_v9, %v336_v12  ;;  %v335_v15 = vmul.f32 %v331_v11, %v2253_v49  ;;  %v332_v16 = vmul.f32 %v331_v11, %v2232_v37  ;;  %v334_v17 = vmul.f32 %v331_v11, %v2242_v42  ;;  %v535_v42 = vld [vmem:[#allocation7 + $0x178] sm:$0xff]  ;;  %v2300_v49 = vld [vmem:[%s2540_s2 + $0x10] sm:$0xff]  ;;  %v520_v9 = vld [vmem:[#allocation7 + $0x100] sm:$0xff] }
 0x204   :  { %v333_v21 = vmul.f32 %v331_v11, %v2236_v39  ;;  %v2295_v39 = vld [vmem:[%s2540_s2 + $0x8] sm:$0xff] }
 0x205   :  { %v341_v14 = vrot.slane %v337_v13, %v2269_v7 }
 0x207   :  { %v345_v18 = vadd.f32 %v341_v14, %v335_v15  ;;  %v342_v19 = vadd.f32 %v341_v14, %v332_v16  ;;  %v344_v20 = vadd.f32 %v341_v14, %v334_v17  ;;  %v343_v44 = vadd.f32 %v341_v14, %v333_v21 }
 0x209   :  { %v2280_v41 = vmax.f32 %v345_v18, 0.0  ;;  %v346_v43 = vmax.f32 %v342_v19, 0.0  ;;  %v2283_v45 = vmax.f32 %v344_v20, 0.0  ;;  %v2287_v37 = vmax.f32 %v343_v44, 0.0 }
 0x20b   :  { %1714 = vmatprep.subr.mxu1 %v2280_v41  ;;  %600 = vmatprep.mubr.f32.mxu0 %v346_v43 }
 0x20c   :  { %1715 = vmatpush3.msra.mxu1 %v2280_v41 }
 0x20d   :  { %1716 = vmatprep.subr.mxu1 %v2283_v45 }
 0x20e   :  { %1717 = vmatpush3.msra.mxu1 %v2283_v45 }
 0x20f   :  { %1718 = vmatprep.subr.mxu1 %v2287_v37 }
 0x210   :  { %1719 = vmatpush3.msra.mxu1 %v2287_v37 }
 0x211   :  { %1720 = vmatprep.subr.mxu1 %v346_v43 }
 0x212   :  { %1721 = vmatpush3.msra.mxu1 %v346_v43 }
 0x213   :  { %1723 = vmatmul.mubr.msk.f32.vlgmr.msra.gmra.mxu1 %vm358_vm3, %v2295_v39  ;;  %1734 = vmatprep.subr.mxu1 %v535_v42 }
 0x214   :  { %1725 = vmatprep.mubr.msk.f32.mxu1 %vm358_vm3, %v2300_v49  ;;  %1735 = vmatpush3.msra.mxu1 %v535_v42 }
 0x215   :  { %1736 = vmatprep.subr.mxu1 %v534_v47 }
 0x216   :  { %1737 = vmatpush3.msra.mxu1 %v534_v47 }
 0x217   :  { %1726 = vmatmul.mubr.msk.f32.gmra.mxu1 %vm358_vm3, %v2309_v48  ;;  %1738 = vmatprep.subr.mxu1 %v533_v50 }
 0x218   :  { %1728 = vmatprep.mubr.msk.f32.mxu1 %vm358_vm3, %v2314_v51  ;;  %1739 = vmatpush3.msra.mxu1 %v533_v50 }
 0x219   :  { %1740 = vmatprep.subr.mxu1 %v532_v52 }
 0x21a   :  { %1741 = vmatpush3.msra.mxu1 %v532_v52 }
 0x21b   :  { %1729 = vmatmul.mubr.msk.f32.gmra.mxu1 %vm358_vm3, %v2323_v53  ;;  %1742 = vmatprep.subr.mxu1 %v531_v54 }
 0x21c   :  { %1731 = vmatprep.mubr.msk.f32.mxu1 %vm358_vm3, %v2328_v55  ;;  %1743 = vmatpush3.msra.mxu1 %v531_v54 }
 0x21d   :  { %1744 = vmatprep.subr.mxu1 %v530_v56 }
 0x21e   :  { %1745 = vmatpush3.msra.mxu1 %v530_v56 }
 0x21f   :  { %1732 = vmatmul.mubr.msk.f32.gmra.mxu1 %vm358_vm3, %v2337_v57  ;;  %1746 = vmatprep.subr.mxu1 %v529_v58 }
 0x220   :  { %1747 = vmatpush3.msra.mxu1 %v529_v58 }
 0x221   :  { %1748 = vmatprep.subr.mxu1 %v528_v59 }
 0x222   :  { %1749 = vmatpush3.msra.mxu1 %v528_v59 }
 0x223   :  { %1750 = vmatprep.subr.mxu1 %v527_v60 }
 0x224   :  { %1751 = vmatpush3.msra.mxu1 %v527_v60 }
 0x225   :  { %1752 = vmatprep.subr.mxu1 %v526_v61 }
 0x226   :  { %1753 = vmatpush3.msra.mxu1 %v526_v61 }
 0x227   :  { %1754 = vmatprep.subr.mxu1 %v525_v63 }
 0x228   :  { %1755 = vmatpush3.msra.mxu1 %v525_v63 }
 0x229   :  { %1756 = vmatprep.subr.mxu1 %v524_v3 }
 0x22a   :  { %1757 = vmatpush3.msra.mxu1 %v524_v3 }
 0x22b   :  { %1758 = vmatprep.subr.mxu1 %v523_v5 }
 0x22c   :  { %1759 = vmatpush3.msra.mxu1 %v523_v5 }
 0x22d   :  { %1760 = vmatprep.subr.mxu1 %v522_v6 }
 0x22e   :  { %1761 = vmatpush3.msra.mxu1 %v522_v6 }
 0x22f   :  { %1762 = vmatprep.subr.mxu1 %v521_v8 }
 0x230   :  { %1763 = vmatpush3.msra.mxu1 %v521_v8 }
 0x231   :  { %1764 = vmatprep.subr.mxu1 %v520_v9 }
 0x232   :  { %1765 = vmatpush3.msra.mxu1 %v520_v9 }
 0x2d3   :  { %v1724_v11 = vpop.f32.mrf.mxu1 }
 0x2d5   :  { %v449_v12 = vpop.f32.mrf.mxu1 }
 0x2d6   :  { %601 = vmatmul.mubr.f32.vlgmr.msra.gmra.mxu0 %v449_v12  ;;  %v986_v12 = vld [vmem:[#allocation8 + $0x170] sm:$0xff] }
 0x2d7   :  { %v1727_v13 = vpop.f32.mrf.mxu1  ;;  %605 = vmatprep.mubr.f32.mxu0 %v2287_v37  ;;  %1773 = vmatpush3.msra.mxu0 %v2152_v10 }
 0x2d8   :  { %1774 = vmatprep.subr.mxu0 %v2086_v0 }
 0x2d9   :  { %v459_v14 = vpop.f32.mrf.mxu1  ;;  %1775 = vmatpush3.msra.mxu0 %v2171_v22 }
 0x2da   :  { %606 = vmatmul.mubr.f32.gmra.mxu0 %v1724_v11  ;;  %1776 = vmatprep.subr.mxu0 %v2086_v0  ;;  %v987_v11 = vld [vmem:[#allocation8 + $0x178] sm:$0xff] }
 0x2db   :  { %v1730_v15 = vpop.f32.mrf.mxu1  ;;  %610 = vmatprep.mubr.f32.mxu0 %v2283_v45  ;;  %1777 = vmatpush3.msra.mxu0 %v2175_v23  ;;  %v2380_v23 = vpop.f32.mrf.mxu0 }
 0x2dc   :  { %1778 = vmatprep.subr.mxu0 %v2086_v0 }
 0x2dd   :  { %v469_v16 = vpop.f32.mrf.mxu1  ;;  %1779 = vmatpush3.msra.mxu0 %v2179_v24 }
 0x2de   :  { %611 = vmatmul.mubr.f32.gmra.mxu0 %v459_v14  ;;  %1766 = vmatprep.mubr.f32.mxu1 %v469_v16  ;;  %v984_v14 = vld [vmem:[#allocation8 + $0x160] sm:$0xff]  ;;  %v982_v16 = vld [vmem:[#allocation8 + $0x150] sm:$0xff] }
 0x2df   :  { %v1733_v10 = vpop.f32.mrf.mxu1  ;;  %615 = vmatprep.mubr.f32.mxu0 %v2280_v41  ;;  %1767 = vmatmul.mubr.f32.vlgmr.msra.gmra.mxu1 %v1730_v15  ;;  %v983_v15 = vld [vmem:[#allocation8 + $0x158] sm:$0xff] }
 0x2e0   :  { %1780 = vmatprep.subr.mxu0 %v2086_v0 }
 0x2e1   :  { %v479_v22 = vpop.f32.mrf.mxu1  ;;  %1781 = vmatpush3.msra.mxu0 %v2183_v25 }
 0x2e2   :  { %616 = vmatmul.mubr.f32.gmra.mxu0 %v1727_v13  ;;  %1769 = vmatprep.mubr.f32.mxu1 %v479_v22  ;;  %v985_v13 = vld [vmem:[#allocation8 + $0x168] sm:$0xff]  ;;  %v980_v22 = vld [vmem:[#allocation8 + $0x140] sm:$0xff] }
 0x2e3   :  { %1770 = vmatmul.mubr.f32.gmra.mxu1 %v1733_v10  ;;  %1782 = vmatprep.subr.mxu0 %v2086_v0  ;;  %v981_v10 = vld [vmem:[#allocation8 + $0x148] sm:$0xff] }
 0x2e4   :  { %1783 = vmatpush3.msra.mxu0 %v2187_v26  ;;  %1804 = vmatprep.mubr.msk.f32.mxu0 %vm2087_vm1, %v2086_v0 }
 0x2e5   :  { %1784 = vmatprep.subr.mxu0 %v2086_v0  ;;  %1815 = vmatprep.mubr.msk.f32.mxu1 %vm358_vm3, %v2262_v4 }
 0x2e6   :  { %1785 = vmatpush3.msra.mxu0 %v2191_v27 }
 0x2e7   :  { %1786 = vmatprep.subr.mxu0 %v2086_v0 }
 0x2e8   :  { %1787 = vmatpush3.msra.mxu0 %v2195_v28 }
 0x2e9   :  { %1788 = vmatprep.subr.mxu0 %v2086_v0 }
 0x2ea   :  { %1789 = vmatpush3.msra.mxu0 %v2199_v29 }
 0x2eb   :  { %1790 = vmatprep.subr.mxu0 %v2086_v0 }
 0x2ec   :  { %1791 = vmatpush3.msra.mxu0 %v2203_v30 }
 0x2ed   :  { %1792 = vmatprep.subr.mxu0 %v2086_v0 }
 0x2ee   :  { %1793 = vmatpush3.msra.mxu0 %v2207_v31 }
 0x2ef   :  { %1794 = vmatprep.subr.mxu0 %v2086_v0 }
 0x2f0   :  { %1795 = vmatpush3.msra.mxu0 %v2211_v32 }
 0x2f1   :  { %1796 = vmatprep.subr.mxu0 %v2086_v0 }
 0x2f2   :  { %1797 = vmatpush3.msra.mxu0 %v2215_v33 }
 0x2f3   :  { %1798 = vmatprep.subr.mxu0 %v2086_v0 }
 0x2f4   :  { %1799 = vmatpush3.msra.mxu0 %v2219_v34 }
 0x2f5   :  { %1800 = vmatprep.subr.mxu0 %v2086_v0 }
 0x2f6   :  { %1801 = vmatpush3.msra.mxu0 %v2223_v35 }
 0x2f7   :  { %1802 = vmatprep.subr.mxu0 %v2086_v0 }
 0x2f8   :  { %1803 = vmatpush3.msra.mxu0 %v2226_v36 }
 0x2f9   :  { %1827 = vmatprep.subr.mxu0 %v987_v11 }
 0x396   :  { %v1520_v24 = vpop.f32.mrf.mxu0 }
 0x398   :  { %v1521_v25 = vpop.f32.mrf.mxu0 }
 0x399   :  { %v1522_v31 = vadd.f32 %v1521_v25, %v1520_v24  ;;  %v979_v24 = vld [vmem:[#allocation8 + $0x138] sm:$0xff]  ;;  %v978_v25 = vld [vmem:[#allocation8 + $0x130] sm:$0xff] }
 0x39a   :  { %v1523_v26 = vpop.f32.mrf.mxu0 }
 0x39c   :  { %v1524_v27 = vpop.f32.mrf.mxu0 }
 0x39d   :  { %v1525_v28 = vadd.f32 %v1524_v27, %v1523_v26  ;;  %v977_v26 = vld [vmem:[#allocation8 + $0x128] sm:$0xff] }
 0x39e   :  { %v1526_v29 = vpop.f32.mrf.mxu0 }
 0x39f   :  { %v1768_v30 = vpop.f32.mrf.mxu1 }
 0x3a0   :  { %v1527_v32 = vpop.f32.mrf.mxu0  ;;  %v2382_v34 = vadd.f32 %v1768_v30, %v1525_v28 }
 0x3a1   :  { %v687_v33 = vpop.f32.mrf.mxu1  ;;  %v1528_v18 = vadd.f32 %v1527_v32, %v1526_v29 }
 0x3a2   :  { %v2384_v4 = vadd.f32 %v1522_v31, %v687_v33  ;;  %v1529_v35 = vpop.f32.mrf.mxu0  ;;  %v718_v41 = vmul.f32 %v2382_v34, %v2382_v34 }
 0x3a3   :  { %v1771_v17 = vpop.f32.mrf.mxu1 }
 0x3a4   :  { %v717_v36 = vmul.f32 %v2384_v4, %v2384_v4  ;;  %v1530_v19 = vpop.f32.mrf.mxu0  ;;  %v708_v43 = vadd.f32 %v2382_v34, %v2384_v4 }
 0x3a5   :  { %v1531_v20 = vadd.f32 %v1530_v19, %v1529_v35  ;;  %v697_v21 = vpop.f32.mrf.mxu1  ;;  %v707_v19 = vld [vmem:[%s2544_s6 + $0x3] sm:$0x1] }
 0x3a6   :  { %v2392_v44 = vadd.f32 %v1528_v18, %v697_v21  ;;  %v721_v37 = vadd.f32 %v718_v41, %v717_v36 }
 0x3a7   :  { %v2394_v45 = vadd.f32 %v1771_v17, %v1531_v20  ;;  %v706_v17 = vld [vmem:[%s2544_s6 + $0x2] sm:$0x1] }
 0x3a8   :  { %v709_v42 = vadd.f32 %v708_v43, %v2392_v44  ;;  %v719_v47 = vmul.f32 %v2392_v44, %v2392_v44 }
 0x3a9   :  { %v720_v50 = vmul.f32 %v2394_v45, %v2394_v45 }
 0x3aa   :  { %v710_v52 = vadd.f32 %v709_v42, %v2394_v45  ;;  %v722_v54 = vadd.f32 %v721_v37, %v719_v47 }
 0x3ac   :  { %v711_v56 = vrot.slane %v710_v52, 4  ;;  %v723_v58 = vadd.f32 %v722_v54, %v720_v50 }
 0x3ae   :  { %v712_v59 = vadd.f32 %v711_v56, %v710_v52  ;;  %v724_v60 = vrot.slane %v723_v58, 4 }
 0x3b0   :  { %v713_v61 = vrot.slane %v712_v59, 2  ;;  %v725_v62 = vadd.f32 %v724_v60, %v723_v58 }
 0x3b2   :  { %v714_v63 = vadd.f32 %v713_v61, %v712_v59  ;;  %v726_v1 = vrot.slane %v725_v62, 2  ;;  %v970_v61 = vld [vmem:[#allocation8 + $0xf0] sm:$0xff] }
 0x3b4   :  { %v715_v2 = vrot.slane %v714_v63, 1  ;;  %v727_v3 = vadd.f32 %v726_v1, %v725_v62  ;;  %v954_v62 = vld [vmem:[#allocation8 + $0x70] sm:$0xff]  ;;  %v953_v1 = vld [vmem:[#allocation8 + $0x68] sm:$0xff] }
 0x3b6   :  { %v728_v5 = vrot.slane %v727_v3, 1  ;;  %v716_v6 = vadd.f32 %v715_v2, %v714_v63  ;;  %v969_v63 = vld [vmem:[#allocation8 + $0xe8] sm:$0xff]  ;;  %v968_v2 = vld [vmem:[#allocation8 + $0xe0] sm:$0xff] }
 0x3b8   :  { %v729_v8 = vadd.f32 %v728_v5, %v727_v3  ;;  %v952_v3 = vld [vmem:[#allocation8 + $0x60] sm:$0xff]  ;;  %v951_v5 = vld [vmem:[#allocation8 + $0x58] sm:$0xff] }
 0x3ba   :  { %v730_v9 = vsel %vm228_vm2, %v716_v6, %v729_v8  ;;  %v950_v6 = vld [vmem:[#allocation8 + $0x50] sm:$0xff]  ;;  %v949_v8 = vld [vmem:[#allocation8 + $0x48] sm:$0xff] }
 0x3bb   :  { %1805 = vmatmul.mubr.f32.vlgmr.msra.gmra.mxu0 %v730_v9  ;;  %v948_v9 = vld [vmem:[#allocation8 + $0x40] sm:$0xff] }
 0x3bc   :  { %1828 = vmatpush3.msra.mxu0 %v987_v11  ;;  %v963_v11 = vld [vmem:[#allocation8 + $0xb8] sm:$0xff] }
 0x3bd   :  { %1829 = vmatprep.subr.mxu0 %v986_v12 }
 0x3be   :  { %1830 = vmatpush3.msra.mxu0 %v986_v12  ;;  %v962_v12 = vld [vmem:[#allocation8 + $0xb0] sm:$0xff] }
 0x3bf   :  { %1831 = vmatprep.subr.mxu0 %v985_v13 }
 0x3c0   :  { %1832 = vmatpush3.msra.mxu0 %v985_v13  ;;  %v961_v13 = vld [vmem:[#allocation8 + $0xa8] sm:$0xff] }
 0x3c1   :  { %1833 = vmatprep.subr.mxu0 %v984_v14 }
 0x3c2   :  { %1834 = vmatpush3.msra.mxu0 %v984_v14  ;;  %v945_v14 = vld [vmem:[#allocation8 + $0x28] sm:$0xff] }
 0x3c3   :  { %1835 = vmatprep.subr.mxu0 %v983_v15 }
 0x3c4   :  { %1836 = vmatpush3.msra.mxu0 %v983_v15  ;;  %v960_v15 = vld [vmem:[#allocation8 + $0xa0] sm:$0xff] }
 0x3c5   :  { %1837 = vmatprep.subr.mxu0 %v982_v16 }
 0x3c6   :  { %1838 = vmatpush3.msra.mxu0 %v982_v16  ;;  %v944_v16 = vld [vmem:[#allocation8 + $0x20] sm:$0xff] }
 0x3c7   :  { %1839 = vmatprep.subr.mxu0 %v981_v10 }
 0x3c8   :  { %1840 = vmatpush3.msra.mxu0 %v981_v10  ;;  %v943_v10 = vld [vmem:[#allocation8 + $0x18] sm:$0xff] }
 0x3c9   :  { %1841 = vmatprep.subr.mxu0 %v980_v22 }
 0x3ca   :  { %1842 = vmatpush3.msra.mxu0 %v980_v22  ;;  %v958_v22 = vld [vmem:[#allocation8 + $0x90] sm:$0xff] }
 0x3cb   :  { %1843 = vmatprep.subr.mxu0 %v979_v24 }
 0x3cc   :  { %1844 = vmatpush3.msra.mxu0 %v979_v24  ;;  %v942_v24 = vld [vmem:[#allocation8 + $0x10] sm:$0xff] }
 0x3cd   :  { %1845 = vmatprep.subr.mxu0 %v978_v25 }
 0x3ce   :  { %1846 = vmatpush3.msra.mxu0 %v978_v25  ;;  %v957_v25 = vld [vmem:[#allocation8 + $0x88] sm:$0xff] }
 0x3cf   :  { %1847 = vmatprep.subr.mxu0 %v977_v26 }
 0x3d0   :  { %1848 = vmatpush3.msra.mxu0 %v977_v26  ;;  %v941_v26 = vld [vmem:[#allocation8 + $0x8] sm:$0xff] }
 0x47b   :  { %v797_v27 = vpop.f32.mrf.mxu0 }
 0x47c   :  { %v801_v28 = vmul.f32 0.001953125, %v797_v27  ;;  %v956_v27 = vld [vmem:[#allocation8 + $0x80] sm:$0xff] }
 0x47d   :  { %v1806_v29 = vpop.f32.mrf.mxu0 }
 0x47e   :  { %v802_v30 = vmul.f32 %v801_v28, %v801_v28  ;;  %v940_v29 = vld [vmem:[#allocation8] sm:$0xff] }
 0x480   :  { %v804_v31 = vrot.slane %v802_v30, 7  ;;  %v975_v30 = vld [vmem:[#allocation8 + $0x118] sm:$0xff] }
 0x482   :  { %v806_v32 = vsub.f32 %v801_v28, %v804_v31  ;;  %v974_v31 = vld [vmem:[#allocation8 + $0x110] sm:$0xff] }
 0x484   :  { %v807_v33 = vadd.f32 1e-05, %v806_v32  ;;  %v973_v32 = vld [vmem:[#allocation8 + $0x108] sm:$0xff] }
 0x486   :  { %1948 = vrsqrt.f32 %v807_v33  ;;  %v972_v33 = vld [vmem:[#allocation8 + $0x100] sm:$0xff] }
 0x493   :  { %v1949_v35 = vpop.eup %1948 }
 0x494   :  { %v810_v18 = vrot.slane %v1949_v35, 1 }
 0x496   :  { %v812_v36 = vmul.f32 %v810_v18, %v706_v17 }
 0x498   :  { %v816_v20 = vrot.slane %v812_v36, %v2269_v7  ;;  %v821_v21 = vmul.f32 %v812_v36, %v801_v28  ;;  %v976_v28 = vld [vmem:[#allocation8 + $0x120] sm:$0xff]  ;;  %v1954_v36 = vld [vmem:[#allocation5 + $0x78] sm:$0xff] }
 0x499   :  { %1849 = vmatprep.subr.mxu0 %v976_v28 }
 0x49a   :  { %v822_v41 = vsub.f32 %v707_v19, %v821_v21  ;;  %v820_v37 = vmul.f32 %v816_v20, %v2394_v45  ;;  %v819_v42 = vmul.f32 %v816_v20, %v2392_v44  ;;  %v818_v52 = vmul.f32 %v816_v20, %v2382_v34  ;;  %v971_v44 = vld [vmem:[#allocation8 + $0xf8] sm:$0xff]  ;;  %1850 = vmatpush3.msra.mxu0 %v976_v28 }
 0x49b   :  { %v817_v58 = vmul.f32 %v816_v20, %v2384_v4  ;;  %v955_v4 = vld [vmem:[#allocation8 + $0x78] sm:$0xff]  ;;  %1851 = vmatprep.subr.mxu0 %v975_v30  ;;  %v1955_v20 = vld [vmem:[#allocation5 + $0x70] sm:$0xff]  ;;  %v1295_v21 = vmul.f32 %v2238_v40, %v2238_v40 }
 0x49c   :  { %v826_v43 = vrot.slane %v822_v41, %v2269_v7  ;;  %1852 = vmatpush3.msra.mxu0 %v975_v30 }
 0x49d   :  { %1853 = vmatprep.subr.mxu0 %v974_v31 }
 0x49e   :  { %v830_v47 = vadd.f32 %v826_v43, %v820_v37  ;;  %v829_v50 = vadd.f32 %v826_v43, %v819_v42  ;;  %v828_v56 = vadd.f32 %v826_v43, %v818_v52  ;;  %v827_v60 = vadd.f32 %v826_v43, %v817_v58  ;;  %1854 = vmatpush3.msra.mxu0 %v974_v31  ;;  %v1956_v43 = vld [vmem:[#allocation5 + $0x68] sm:$0xff] }
 0x49f   :  { %1855 = vmatprep.subr.mxu0 %v973_v32  ;;  %v1294_v37 = vmul.f32 %v2234_v38, %v2234_v38  ;;  %v1296_v42 = vmul.f32 %v2250_v46, %v2250_v46 }
 0x4a0   :  { %v2414_v54 = vmax.f32 %v830_v47, 0.0  ;;  %v2418_v59 = vmax.f32 %v829_v50, 0.0  ;;  %v2422_v45 = vmax.f32 %v828_v56, 0.0  ;;  %v831_v34 = vmax.f32 %v827_v60, 0.0  ;;  %1856 = vmatpush3.msra.mxu0 %v973_v32  ;;  %v1957_v50 = vld [vmem:[#allocation5 + $0x60] sm:$0xff] }
 0x4a1   :  { %1857 = vmatprep.subr.mxu0 %v972_v33  ;;  %v1298_v52 = vadd.f32 %v1295_v21, %v1294_v37  ;;  %v1297_v56 = vmul.f32 %v2380_v23, %v2380_v23 }
 0x4a2   :  { %1807 = vmatprep.subr.mxu1 %v2414_v54  ;;  %1858 = vmatpush3.msra.mxu0 %v972_v33 }
 0x4a3   :  { %1808 = vmatpush3.msra.mxu1 %v2414_v54  ;;  %1900 = vmatprep.subr.mxu0 %v2086_v0  ;;  %v1299_v60 = vadd.f32 %v1298_v52, %v1296_v42 }
 0x4a4   :  { %1809 = vmatprep.subr.mxu1 %v2418_v59 }
 0x4a5   :  { %1810 = vmatpush3.msra.mxu1 %v2418_v59 }
 0x4a6   :  { %1811 = vmatprep.subr.mxu1 %v2422_v45 }
 0x4a7   :  { %1812 = vmatpush3.msra.mxu1 %v2422_v45 }
 0x4a8   :  { %1813 = vmatprep.subr.mxu1 %v831_v34 }
 0x4a9   :  { %1814 = vmatpush3.msra.mxu1 %v831_v34 }
 0x4aa   :  { %1816 = vmatmul.mubr.msk.f32.vlgmr.msra.gmra.mxu1 %vm358_vm3, %v2295_v39  ;;  %1581 = vmatprep.subr.mxu1 %v971_v44  ;;  %v967_v39 = vld [vmem:[#allocation8 + $0xd8] sm:$0xff] }
 0x4ab   :  { %1818 = vmatprep.mubr.msk.f32.mxu1 %vm358_vm3, %v2300_v49  ;;  %1582 = vmatpush3.msra.mxu1 %v955_v4  ;;  %v966_v49 = vld [vmem:[#allocation8 + $0xd0] sm:$0xff]  ;;  %v1300_v4 = vadd.f32 %v1299_v60, %v1297_v56 }
 0x4ac   :  { %1583 = vmatprep.subr.mxu1 %v970_v61  ;;  %v1959_v61 = vld [vmem:[#allocation5 + $0x50] sm:$0xff] }
 0x4ad   :  { %1584 = vmatpush3.msra.mxu1 %v954_v62  ;;  %v1301_v62 = vrot.slane %v1300_v4, 4 }
 0x4ae   :  { %1819 = vmatmul.mubr.msk.f32.gmra.mxu1 %vm358_vm3, %v2309_v48  ;;  %1585 = vmatprep.subr.mxu1 %v969_v63  ;;  %v965_v48 = vld [vmem:[#allocation8 + $0xc8] sm:$0xff] }
 0x4af   :  { %1821 = vmatprep.mubr.msk.f32.mxu1 %vm358_vm3, %v2314_v51  ;;  %1586 = vmatpush3.msra.mxu1 %v953_v1  ;;  %v964_v51 = vld [vmem:[#allocation8 + $0xc0] sm:$0xff]  ;;  %v1960_v63 = vld [vmem:[#allocation5 + $0x48] sm:$0xff] }
 0x4b0   :  { %1587 = vmatprep.subr.mxu1 %v968_v2  ;;  %v1961_v2 = vld [vmem:[#allocation5 + $0x40] sm:$0xff] }
 0x4b1   :  { %1588 = vmatpush3.msra.mxu1 %v952_v3  ;;  %v1302_v3 = vadd.f32 %v1301_v62, %v1300_v4 }
 0x4b2   :  { %1822 = vmatmul.mubr.msk.f32.gmra.mxu1 %vm358_vm3, %v2323_v53  ;;  %1589 = vmatprep.subr.mxu1 %v967_v39  ;;  %v947_v53 = vld [vmem:[#allocation8 + $0x38] sm:$0xff] }
 0x4b3   :  { %1824 = vmatprep.mubr.msk.f32.mxu1 %vm358_vm3, %v2328_v55  ;;  %1590 = vmatpush3.msra.mxu1 %v951_v5  ;;  %v946_v55 = vld [vmem:[#allocation8 + $0x30] sm:$0xff]  ;;  %v1962_v39 = vld [vmem:[#allocation5 + $0x38] sm:$0xff] }
 0x4b4   :  { %1591 = vmatprep.subr.mxu1 %v966_v49  ;;  %v1963_v49 = vld [vmem:[#allocation5 + $0x30] sm:$0xff] }
 0x4b5   :  { %1592 = vmatpush3.msra.mxu1 %v950_v6  ;;  %v1303_v6 = vrot.slane %v1302_v3, 2 }
 0x4b6   :  { %1825 = vmatmul.mubr.msk.f32.gmra.mxu1 %vm358_vm3, %v2337_v57  ;;  %1593 = vmatprep.subr.mxu1 %v965_v48  ;;  %v959_v57 = vld [vmem:[#allocation8 + $0x98] sm:$0xff]  ;;  %v1964_v48 = vld [vmem:[#allocation5 + $0x28] sm:$0xff] }
 0x4b7   :  { %1052 = vmatprep.mubr.f32.mxu1 %v831_v34  ;;  %1594 = vmatpush3.msra.mxu1 %v949_v8  ;;  %v1958_v34 = vld [vmem:[#allocation5 + $0x58] sm:$0xff] }
 0x4b8   :  { %1595 = vmatprep.subr.mxu1 %v964_v51  ;;  %v1965_v51 = vld [vmem:[#allocation5 + $0x20] sm:$0xff] }
 0x4b9   :  { %1596 = vmatpush3.msra.mxu1 %v948_v9  ;;  %v1304_v9 = vadd.f32 %v1303_v6, %v1302_v3 }
 0x4ba   :  { %1597 = vmatprep.subr.mxu1 %v963_v11  ;;  %v1966_v11 = vld [vmem:[#allocation5 + $0x18] sm:$0xff] }
 0x4bb   :  { %1598 = vmatpush3.msra.mxu1 %v947_v53 }
 0x4bc   :  { %1599 = vmatprep.subr.mxu1 %v962_v12  ;;  %v1967_v12 = vld [vmem:[#allocation5 + $0x10] sm:$0xff] }
 0x4bd   :  { %1600 = vmatpush3.msra.mxu1 %v946_v55  ;;  %v1305_v55 = vrot.slane %v1304_v9, 1 }
 0x4be   :  { %1601 = vmatprep.subr.mxu1 %v961_v13  ;;  %v1968_v13 = vld [vmem:[#allocation5 + $0x8] sm:$0xff] }
 0x4bf   :  { %1602 = vmatpush3.msra.mxu1 %v945_v14 }
 0x4c0   :  { %1603 = vmatprep.subr.mxu1 %v960_v15  ;;  %v1969_v15 = vld [vmem:[#allocation5] sm:$0xff] }
 0x4c1   :  { %1604 = vmatpush3.msra.mxu1 %v944_v16  ;;  %v1306_v16 = vadd.f32 %v1305_v55, %v1304_v9 }
 0x4c2   :  { %1605 = vmatprep.subr.mxu1 %v959_v57 }
 0x4c3   :  { %1606 = vmatpush3.msra.mxu1 %v943_v10 }
 0x4c4   :  { %1607 = vmatprep.subr.mxu1 %v958_v22 }
 0x4c5   :  { %1608 = vmatpush3.msra.mxu1 %v942_v24 }
 0x4c6   :  { %1609 = vmatprep.subr.mxu1 %v957_v25 }
 0x4c7   :  { %1610 = vmatpush3.msra.mxu1 %v941_v26 }
 0x4c8   :  { %1611 = vmatprep.subr.mxu1 %v956_v27 }
 0x4c9   :  { %1612 = vmatpush3.msra.mxu1 %v940_v29 }
 0x4ca   :  { %1865 = vmatprep.subr.mxu1 %v2086_v0 }
 0x56a   :  { %v1817_v35 = vpop.f32.mrf.mxu1 }
 0x56c   :  { %v901_v17 = vpop.f32.mrf.mxu1 }
 0x56d   :  { %1053 = vmatmul.mubr.f32.vlgmr.msra.gmra.mxu1 %v901_v17 }
 0x56e   :  { %v1820_v18 = vpop.f32.mrf.mxu1  ;;  %1057 = vmatprep.mubr.f32.mxu1 %v2422_v45  ;;  %1866 = vmatpush3.msra.mxu1 %v1954_v36 }
 0x56f   :  { %1867 = vmatprep.subr.mxu1 %v2086_v0 }
 0x570   :  { %v911_v19 = vpop.f32.mrf.mxu1  ;;  %1868 = vmatpush3.msra.mxu1 %v1955_v20 }
 0x571   :  { %1058 = vmatmul.mubr.f32.gmra.mxu1 %v1817_v35  ;;  %1869 = vmatprep.subr.mxu1 %v2086_v0 }
 0x572   :  { %v1823_v41 = vpop.f32.mrf.mxu1  ;;  %1062 = vmatprep.mubr.f32.mxu1 %v2418_v59  ;;  %1870 = vmatpush3.msra.mxu1 %v1956_v43  ;;  %v1285_v59 = vadd.f32 %v2238_v40, %v2234_v38 }
 0x573   :  { %1871 = vmatprep.subr.mxu1 %v2086_v0 }
 0x574   :  { %v921_v47 = vpop.f32.mrf.mxu1  ;;  %1872 = vmatpush3.msra.mxu1 %v1957_v50  ;;  %v1286_v44 = vadd.f32 %v1285_v59, %v2250_v46 }
 0x575   :  { %1063 = vmatmul.mubr.f32.gmra.mxu1 %v911_v19  ;;  %1859 = vmatprep.mubr.f32.mxu0 %v921_v47 }
 0x576   :  { %v1826_v58 = vpop.f32.mrf.mxu1  ;;  %1067 = vmatprep.mubr.f32.mxu1 %v2414_v54  ;;  %1860 = vmatmul.mubr.f32.vlgmr.msra.gmra.mxu0 %v1823_v41  ;;  %v1287_v54 = vadd.f32 %v1286_v44, %v2380_v23 }
 0x577   :  { %1901 = vmatpush3.msra.mxu0 %v1954_v36  ;;  %1873 = vmatprep.subr.mxu1 %v2086_v0 }
 0x578   :  { %1902 = vmatprep.subr.mxu0 %v2086_v0  ;;  %v931_v45 = vpop.f32.mrf.mxu1  ;;  %1874 = vmatpush3.msra.mxu1 %v1958_v34  ;;  %v1288_v1 = vrot.slane %v1287_v54, 4 }
 0x579   :  { %1903 = vmatpush3.msra.mxu0 %v1955_v20  ;;  %1068 = vmatmul.mubr.f32.gmra.mxu1 %v1820_v18 }
 0x57a   :  { %1862 = vmatprep.mubr.f32.mxu0 %v931_v45  ;;  %1904 = vmatprep.subr.mxu0 %v2086_v0  ;;  %v1289_v5 = vadd.f32 %v1288_v1, %v1287_v54 }
 0x57b   :  { %1863 = vmatmul.mubr.f32.gmra.mxu0 %v1826_v58  ;;  %1875 = vmatprep.subr.mxu1 %v2086_v0 }
 0x57c   :  { %1905 = vmatpush3.msra.mxu0 %v1956_v43  ;;  %1932 = vmatprep.mubr.msk.f32.mxu0 %vm2087_vm1, %v2086_v0  ;;  %v1290_v8 = vrot.slane %v1289_v5, 2 }
 0x57d   :  { %1906 = vmatprep.subr.mxu0 %v2086_v0  ;;  %1876 = vmatpush3.msra.mxu1 %v1959_v61 }
 0x57e   :  { %1907 = vmatpush3.msra.mxu0 %v1957_v50  ;;  %1877 = vmatprep.subr.mxu1 %v2086_v0  ;;  %v1291_v53 = vadd.f32 %v1290_v8, %v1289_v5 }
 0x57f   :  { %1908 = vmatprep.subr.mxu0 %v2086_v0  ;;  %1878 = vmatpush3.msra.mxu1 %v1960_v63 }
 0x580   :  { %1909 = vmatpush3.msra.mxu0 %v1958_v34  ;;  %1879 = vmatprep.subr.mxu1 %v2086_v0  ;;  %v1292_v14 = vrot.slane %v1291_v53, 1 }
 0x581   :  { %1910 = vmatprep.subr.mxu0 %v2086_v0  ;;  %1880 = vmatpush3.msra.mxu1 %v1961_v2 }
 0x582   :  { %1911 = vmatpush3.msra.mxu0 %v1959_v61  ;;  %1881 = vmatprep.subr.mxu1 %v2086_v0  ;;  %v1293_v57 = vadd.f32 %v1292_v14, %v1291_v53 }
 0x583   :  { %1912 = vmatprep.subr.mxu0 %v2086_v0  ;;  %1882 = vmatpush3.msra.mxu1 %v1962_v39 }
 0x584   :  { %1913 = vmatpush3.msra.mxu0 %v1960_v63  ;;  %1883 = vmatprep.subr.mxu1 %v2086_v0  ;;  %v1307_v10 = vsel %vm228_vm2, %v1293_v57, %v1306_v16 }
 0x585   :  { %1914 = vmatprep.subr.mxu0 %v2086_v0  ;;  %1884 = vmatpush3.msra.mxu1 %v1963_v49 }
 0x586   :  { %1915 = vmatpush3.msra.mxu0 %v1961_v2  ;;  %1885 = vmatprep.subr.mxu1 %v2086_v0 }
 0x587   :  { %1916 = vmatprep.subr.mxu0 %v2086_v0  ;;  %1886 = vmatpush3.msra.mxu1 %v1964_v48 }
 0x588   :  { %1917 = vmatpush3.msra.mxu0 %v1962_v39  ;;  %1887 = vmatprep.subr.mxu1 %v2086_v0 }
 0x589   :  { %1918 = vmatprep.subr.mxu0 %v2086_v0  ;;  %1888 = vmatpush3.msra.mxu1 %v1965_v51 }
 0x58a   :  { %1919 = vmatpush3.msra.mxu0 %v1963_v49  ;;  %1889 = vmatprep.subr.mxu1 %v2086_v0 }
 0x58b   :  { %1920 = vmatprep.subr.mxu0 %v2086_v0  ;;  %1890 = vmatpush3.msra.mxu1 %v1966_v11 }
 0x58c   :  { %1921 = vmatpush3.msra.mxu0 %v1964_v48  ;;  %1891 = vmatprep.subr.mxu1 %v2086_v0 }
 0x58d   :  { %1922 = vmatprep.subr.mxu0 %v2086_v0  ;;  %1892 = vmatpush3.msra.mxu1 %v1967_v12 }
 0x58e   :  { %1923 = vmatpush3.msra.mxu0 %v1965_v51  ;;  %1893 = vmatprep.subr.mxu1 %v2086_v0 }
 0x58f   :  { %1924 = vmatprep.subr.mxu0 %v2086_v0  ;;  %1894 = vmatpush3.msra.mxu1 %v1968_v13 }
 0x590   :  { %1925 = vmatpush3.msra.mxu0 %v1966_v11  ;;  %1895 = vmatprep.subr.mxu1 %v2086_v0 }
 0x591   :  { %1926 = vmatprep.subr.mxu0 %v2086_v0  ;;  %1896 = vmatpush3.msra.mxu1 %v1969_v15 }
 0x592   :  { %1927 = vmatpush3.msra.mxu0 %v1967_v12  ;;  %1897 = vmatprep.mubr.msk.f32.mxu1 %vm2087_vm1, %v2086_v0 }
 0x593   :  { %1928 = vmatprep.subr.mxu0 %v2086_v0 }
 0x594   :  { %1929 = vmatpush3.msra.mxu0 %v1968_v13 }
 0x595   :  { %1930 = vmatprep.subr.mxu0 %v2086_v0 }
 0x596   :  { %1931 = vmatpush3.msra.mxu0 %v1969_v15 }
 0x597   :  { %1933 = vmatmul.mubr.f32.vlgmr.msra.gmra.mxu0 %v1307_v10 }
 0x62d   :  { %v1613_v22 = vpop.f32.mrf.mxu1 }
 0x62f   :  { %v1614_v24 = vpop.f32.mrf.mxu1 }
 0x630   :  { %v1615_v30 = vadd.f32 %v1614_v24, %v1613_v22  ;;  %v1283_v22 = vld [vmem:[%s2544_s6 + $0x6] sm:$0x1] }
 0x631   :  { %v1616_v25 = vpop.f32.mrf.mxu1 }
 0x633   :  { %v1617_v26 = vpop.f32.mrf.mxu1 }
 0x634   :  { %v1618_v28 = vadd.f32 %v1617_v26, %v1616_v25  ;;  %v1284_v26 = vld [vmem:[%s2544_s6 + $0x7] sm:$0x1] }
 0x635   :  { %v1619_v27 = vpop.f32.mrf.mxu1 }
 0x636   :  { %v1861_v29 = vpop.f32.mrf.mxu0 }
 0x637   :  { %v1620_v31 = vpop.f32.mrf.mxu1  ;;  %v2495_v17 = vadd.f32 %v1861_v29, %v1618_v28  ;;  %v1158_v28 = vld [vmem:[%s2544_s6 + $0x4] sm:$0x1] }
 0x638   :  { %v1139_v32 = vpop.f32.mrf.mxu0  ;;  %v1621_v36 = vadd.f32 %v1620_v31, %v1619_v27 }
 0x639   :  { %v2493_v33 = vadd.f32 %v1615_v30, %v1139_v32  ;;  %v1622_v35 = vpop.f32.mrf.mxu1  ;;  %v1170_v41 = vmul.f32 %v2495_v17, %v2495_v17 }
 0x63b   :  { %v1864_v0 = vpop.f32.mrf.mxu0  ;;  %v1623_v18 = vpop.f32.mrf.mxu1  ;;  %v1169_v19 = vmul.f32 %v2493_v33, %v2493_v33  ;;  %v1160_v43 = vadd.f32 %v2495_v17, %v2493_v33 }
 0x63c   :  { %v1624_v20 = vadd.f32 %v1623_v18, %v1622_v35  ;;  %v1159_v35 = vld [vmem:[%s2544_s6 + $0x5] sm:$0x1]  ;;  %s2088_s6 = smov [#allocation10]  }
 0x63d   :  { %v1149_v21 = vpop.f32.mrf.mxu0  ;;  %v1173_v47 = vadd.f32 %v1170_v41, %v1169_v19  ;;  %s1425_s12 = sshll.u32 %s2088_s6, 4  ;;  %s1426_s12 = int_to_ptr.vmem [resolvable:$true] %s1425_s12 }
 0x63e   :  { %v2503_v37 = vadd.f32 %v1864_v0, %v1624_v20  ;;  %v1150_v42 = vadd.f32 %v1621_v36, %v1149_v21  ;;  %s2050_s13 = scalar_lea.vmem %s1426_s12, 512  ;;  %p2055_p7 = scmp.lt.s32.totalorder %s1426_s12, %s1426_s12 }
 0x63f   :  { %p2051_p6 = scmp.ne.s32.totalorder %s1426_s12, %s2050_s13  ;;  %p2056_p8 = scmp.lt.s32.totalorder %s2050_s13, %s2050_s13 }
 0x640   :  { %v1172_v50 = vmul.f32 %v2503_v37, %v2503_v37  ;;  %v1161_v52 = vadd.f32 %v1160_v43, %v1150_v42  ;;  %v1171_v56 = vmul.f32 %v1150_v42, %v1150_v42 }
 0x641   :  { %p2057_p9 = por %p2056_p8, %p2055_p7 }
 0x642   :  { %v1162_v58 = vadd.f32 %v1161_v52, %v2503_v37  ;;  %v1174_v59 = vadd.f32 %v1173_v47, %v1171_v56 }
 0x643   :  { %p2058_p10 = pnand %p2057_p9, %p2051_p6 }
 0x644   :  { %v1163_v60 = vrot.slane %v1162_v58, 4  ;;  %v1175_v45 = vadd.f32 %v1174_v59, %v1172_v50 }
 0x646   :  { %v1164_v34 = vadd.f32 %v1163_v60, %v1162_v58  ;;  %v1176_v44 = vrot.slane %v1175_v45, 4 }
 0x648   :  { %v1165_v4 = vrot.slane %v1164_v34, 2  ;;  %v1177_v54 = vadd.f32 %v1176_v44, %v1175_v45 }
 0x64a   :  { %v1166_v61 = vadd.f32 %v1165_v4, %v1164_v34  ;;  %v1178_v62 = vrot.slane %v1177_v54, 2 }
 0x64c   :  { %v1167_v63 = vrot.slane %v1166_v61, 1  ;;  %v1179_v1 = vadd.f32 %v1178_v62, %v1177_v54 }
 0x64e   :  { %v1180_v2 = vrot.slane %v1179_v1, 1  ;;  %v1168_v3 = vadd.f32 %v1167_v63, %v1166_v61 }
 0x650   :  { %v1181_v39 = vadd.f32 %v1180_v2, %v1179_v1 }
 0x652   :  { %v1182_v5 = vsel %vm228_vm2, %v1168_v3, %v1181_v39 }
 0x653   :  { %1898 = vmatmul.mubr.f32.vlgmr.msra.gmra.mxu1 %v1182_v5 }
 0x657   :  { %v1374_v49 = vpop.f32.mrf.mxu0 }
 0x658   :  { %v1378_v48 = vmul.f32 0.001953125, %v1374_v49 }
 0x659   :  { %v1934_v6 = vpop.f32.mrf.mxu0 }
 0x65a   :  { %v1379_v8 = vmul.f32 %v1378_v48, %v1378_v48 }
 0x65c   :  { %v1381_v51 = vrot.slane %v1379_v8, 7 }
 0x65e   :  { %v1383_v9 = vsub.f32 %v1378_v48, %v1381_v51 }
 0x660   :  { %v1384_v11 = vadd.f32 1e-05, %v1383_v9 }
 0x662   :  { %1950 = vrsqrt.f32 %v1384_v11 }
 0x66f   :  { %v1951_v57 = vpop.eup %1950 }
 0x670   :  { %v1387_v10 = vrot.slane %v1951_v57, 1 }
 0x672   :  { %v1389_v24 = vmul.f32 %v1387_v10, %v1283_v22 }
 0x674   :  { %v1398_v25 = vmul.f32 %v1389_v24, %v1378_v48  ;;  %v1393_v31 = vrot.slane %v1389_v24, %v2269_v7 }
 0x676   :  { %v1399_v30 = vsub.f32 %v1284_v26, %v1398_v25  ;;  %v1394_v20 = vmul.f32 %v1393_v31, %v2234_v38  ;;  %v1395_v41 = vmul.f32 %v1393_v31, %v2238_v40  ;;  %v1396_v43 = vmul.f32 %v1393_v31, %v2250_v46 }
 0x677   :  { %v1397_v47 = vmul.f32 %v1393_v31, %v2380_v23 }
 0x678   :  { %v1403_v36 = vrot.slane %v1399_v30, %v2269_v7 }
 0x67a   :  { %v1404_v59 = vadd.f32 %v1403_v36, %v1394_v20  ;;  %v1405_v60 = vadd.f32 %v1403_v36, %v1395_v41  ;;  %v1406_v45 = vadd.f32 %v1403_v36, %v1396_v43  ;;  %v1407_v34 = vadd.f32 %v1403_v36, %v1397_v47 }
 0x713   :  { %v1249_v53 = vpop.f32.mrf.mxu1 }
 0x714   :  { %v1253_v12 = vmul.f32 0.001953125, %v1249_v53 }
 0x715   :  { %v1899_v55 = vpop.f32.mrf.mxu1 }
 0x716   :  { %v1254_v13 = vmul.f32 %v1253_v12, %v1253_v12 }
 0x718   :  { %v1256_v14 = vrot.slane %v1254_v13, 7 }
 0x71a   :  { %v1258_v15 = vsub.f32 %v1253_v12, %v1256_v14 }
 0x71c   :  { %v1259_v16 = vadd.f32 1e-05, %v1258_v15 }
 0x71e   :  { %1952 = vrsqrt.f32 %v1259_v16 }
 0x72b   :  { %v1953_v27 = vpop.eup %1952 }
 0x72c   :  { %v1262_v29 = vrot.slane %v1953_v27, 1 }
 0x72e   :  { %v1264_v32 = vmul.f32 %v1262_v29, %v1158_v28 }
 0x730   :  { %v1268_v0 = vrot.slane %v1264_v32, %v2269_v7  ;;  %v1273_v18 = vmul.f32 %v1264_v32, %v1253_v12 }
 0x732   :  { %v1274_v19 = vsub.f32 %v1159_v35, %v1273_v18  ;;  %v1269_v21 = vmul.f32 %v1268_v0, %v2493_v33  ;;  %v1270_v52 = vmul.f32 %v1268_v0, %v2495_v17  ;;  %v1271_v56 = vmul.f32 %v1268_v0, %v1150_v42 }
 0x733   :  { %v1272_v58 = vmul.f32 %v1268_v0, %v2503_v37 }
 0x734   :  { %v1278_v50 = vrot.slane %v1274_v19, %v2269_v7 }
 0x736   :  { %v1279_v38 = vadd.f32 %v1278_v50, %v1269_v21  ;;  %v1280_v44 = vadd.f32 %v1278_v50, %v1270_v52  ;;  %v1281_v33 = vadd.f32 %v1278_v50, %v1271_v56  ;;  %v1282_v4 = vadd.f32 %v1278_v50, %v1272_v58 }
 0x738   :  { %v1408_v40 = vadd.f32 %v1404_v59, %v1279_v38  ;;  %v1409_v46 = vadd.f32 %v1405_v60, %v1280_v44  ;;  %v1410_v23 = vadd.f32 %v1406_v45, %v1281_v33  ;;  %v1411_v54 = vadd.f32 %v1407_v34, %v1282_v4 }
 0x73a   :  { %v1412_v7 = vmax.f32 %v1408_v40, 0.0  ;;  %v1413_v61 = vmax.f32 %v1409_v46, 0.0  ;;  %v1414_v17 = vmax.f32 %v1410_v23, 0.0  ;;  %v1415_v42 = vmax.f32 %v1411_v54, 0.0 }
 0x73c   :  { %1416 = vst [vmem:[#allocation10] sm:$0xff] %v1412_v7  ;;  %1417 = vst [vmem:[#allocation10 + $0x8] sm:$0xff] %v1413_v61 }
 0x73d   :  { %1418 = vst [vmem:[#allocation10 + $0x10] sm:$0xff] %v1414_v17  ;;  %1419 = vst [vmem:[#allocation10 + $0x18] sm:$0xff] %v1415_v42 }
 0x73e   :  { %2061 = shalt.err (!%p2058_p10)
}
 0x73f   :  { %1431 = dma.vmem_to_hbm [thread:$0]  %s1426_s12, 512, %s2545_s7, [#allocation4], %s2079_s27, %s2079_s27, %s2080_s28  }
 0x740   :  { %2076 = dma.done.wait [#allocation4], 512  }
 0x741   :  { %2077 = vsyncadd [#allocation4], 4294966784 }
 0x742   :  { %1435 = vsyncpa [#allocation3], 1 }
 0x743   :  { %1436 = vsyncpa [#allocation6], 1 }
 0x744   :  { %1437 = vsyncpa [#allocation9], 1 }
 0x745   :  { %1438 = vsyncpa [#allocation4], 1 }

</bundles_post_ra>
